<compile_context>
chip_gen: v7x
topology: tpu7x:2x2x1
jax: 0.10.0
libtpu: 0.0.40
codegen_flags: <defaults>
</compile_context>

<pallas_src>
import jax
import jax.numpy as jnp
import numpy as np
from jax import lax
from jax.experimental import pallas as pl
from jax.experimental.pallas import tpu as pltpu


def lstm_recurrence_kernel(gx_ref, whh_ref, out_ref):
    """Serial LSTM recurrence.

    gx_ref : (T, B, 4H) f32   precomputed x-side gates (includes b_ih + b_hh)
    whh_ref: (H, 4H)    bf16  recurrent weight (PyTorch gate order i, f, g, o)
    out_ref: (B, H)     f32   last hidden state
    """
    T, B, _ = gx_ref.shape
    H = whh_ref.shape[0]

    def step(t, carry):
        h, c = carry
        # Only the h-side projection stays on the serial path (bf16 MXU, f32 acc).
        gates = gx_ref[t] + jnp.dot(h.astype(jnp.bfloat16), whh_ref[...],
                                    preferred_element_type=jnp.float32)
        i_g = jax.nn.sigmoid(gates[:, 0:H])
        f_g = jax.nn.sigmoid(gates[:, H:2 * H])
        g_g = jnp.tanh(gates[:, 2 * H:3 * H])
        o_g = jax.nn.sigmoid(gates[:, 3 * H:4 * H])
        c_new = f_g * c + i_g * g_g
        h_new = o_g * jnp.tanh(c_new)
        return (h_new, c_new)

    h0 = jnp.zeros((B, H), jnp.float32)
    c0 = jnp.zeros((B, H), jnp.float32)
    # Static trip count -> fully unrolled, gives the scheduler cross-step visibility.
    h_last, _ = lax.fori_loop(0, T, step, (h0, c0), unroll=True)
    out_ref[...] = h_last


def rnn_model_forward(x_ids, params):
    emb, wih_t, whh_t, bih, bhh, wfc_t, bfc = params
    B, T = x_ids.shape
    E = emb.shape[1]
    H = whh_t.shape[0]

    # ---- Hoisted, non-serial work (plain XLA, off the recurrence path) ----
    embedded = jnp.take(emb, x_ids, axis=0)                      # (B, T, E)
    gates_x = embedded.reshape(B * T, E) @ wih_t + (bih + bhh)   # (B*T, 4H)
    gates_x = gates_x.reshape(B, T, 4 * H).transpose(1, 0, 2)    # (T, B, 4H)
    gates_x = gates_x.astype(jnp.float32)

    whh_bf16 = whh_t.astype(jnp.bfloat16)

    # ---- Serial LSTM recurrence in a single Pallas invocation ----
    h_last = pl.pallas_call(
        lstm_recurrence_kernel,
        out_shape=jax.ShapeDtypeStruct((B, H), jnp.float32),
        grid_spec=pltpu.PrefetchScalarGridSpec(
            num_scalar_prefetch=0,
            grid=(1,),
            in_specs=[
                pl.BlockSpec((T, B, 4 * H), lambda i: (0, 0, 0)),  # gates_x
                pl.BlockSpec((H, 4 * H), lambda i: (0, 0)),        # W_hh^T (bf16)
            ],
            out_specs=pl.BlockSpec((B, H), lambda i: (0, 0)),
        ),
        compiler_params=pltpu.CompilerParams(
            dimension_semantics=("arbitrary",)),
    )(gates_x, whh_bf16)

    # ---- Final Linear on the last hidden state (lane-dense kernel output,
    #      tiny (H, 1) projection fused by XLA in the wrapper) ----
    return h_last @ wfc_t + bfc


def rnn_model_reference(x_ids, params):
    """Pure-JAX (f32) reference of the same forward pass."""
    emb, wih_t, whh_t, bih, bhh, wfc_t, bfc = params
    B, T = x_ids.shape
    H = whh_t.shape[0]
    embedded = jnp.take(emb, x_ids, axis=0)          # (B, T, E)

    def step(carry, x_t):
        h, c = carry
        gates = x_t @ wih_t + h @ whh_t + bih + bhh
        i = jax.nn.sigmoid(gates[:, 0:H])
        f = jax.nn.sigmoid(gates[:, H:2 * H])
        g = jnp.tanh(gates[:, 2 * H:3 * H])
        o = jax.nn.sigmoid(gates[:, 3 * H:4 * H])
        c = f * c + i * g
        h = o * jnp.tanh(c)
        return (h, c), None

    h0 = jnp.zeros((B, H), jnp.float32)
    c0 = jnp.zeros((B, H), jnp.float32)
    (h_last, _), _ = lax.scan(step, (h0, c0), jnp.swapaxes(embedded, 0, 1))
    return h_last @ wfc_t + bfc


def init_params(key, vocab, embed_dim, hidden_dim, output_dim):
    ks = jax.random.split(key, 7)
    s = 1.0 / np.sqrt(hidden_dim)
    emb = jax.random.normal(ks[0], (vocab, embed_dim), jnp.float32)
    wih_t = jax.random.uniform(ks[1], (embed_dim, 4 * hidden_dim),
                               jnp.float32, -s, s)
    whh_t = jax.random.uniform(ks[2], (hidden_dim, 4 * hidden_dim),
                               jnp.float32, -s, s)
    bih = jax.random.uniform(ks[3], (1, 4 * hidden_dim), jnp.float32, -s, s)
    bhh = jax.random.uniform(ks[4], (1, 4 * hidden_dim), jnp.float32, -s, s)
    wfc_t = jax.random.uniform(ks[5], (hidden_dim, output_dim),
                               jnp.float32, -s, s)
    bfc = jax.random.uniform(ks[6], (1, output_dim), jnp.float32, -s, s)
    return (emb, wih_t, whh_t, bih, bhh, wfc_t, bfc)


if __name__ == "__main__":
    # Small, module-consistent shapes.
    B, T = 2, 8
    VOCAB, EMBED_DIM, HIDDEN_DIM, OUTPUT_DIM = 50, 300, 128, 1

    key = jax.random.PRNGKey(0)
    k_params, k_ids = jax.random.split(key)
    params = init_params(k_params, VOCAB, EMBED_DIM, HIDDEN_DIM, OUTPUT_DIM)
    x_ids = jax.random.randint(k_ids, (B, T), 0, VOCAB, dtype=jnp.int32)

    out = jax.block_until_ready(rnn_model_forward(x_ids, params))

    ref = jax.block_until_ready(rnn_model_reference(x_ids, params))
    np.testing.assert_allclose(np.asarray(out), np.asarray(ref),
                               rtol=3e-2, atol=3e-2)
    assert out.shape == (B, OUTPUT_DIM)
    print("KERNEL_OK")
</pallas_src>

<mosaic_0001>
module attributes {stable_mosaic.version = 11 : i64} {
  func.func @lstm_recurrence_kernel(%arg0: i32, %arg1: memref<8x2x512xf32, #tpu.memory_space<vmem>>, %arg2: memref<128x512xbf16, #tpu.memory_space<vmem>>, %arg3: memref<2x128xf32, #tpu.memory_space<vmem>>) attributes {dimension_semantics = [#tpu.dimension_semantics<arbitrary>], iteration_bounds = array<i64: 1>, scalar_prefetch = 0 : i64, scratch_operands = 0 : i64, tpu.core_type = #tpu.core_type<tc>, window_params = [{pipeline_mode = #tpu.pipeline_mode<synchronous>, transform_indices = @transform_0, window_bounds = array<i64: 8, 2, 512>}, {pipeline_mode = #tpu.pipeline_mode<synchronous>, transform_indices = @transform_1, window_bounds = array<i64: 128, 512>}, {pipeline_mode = #tpu.pipeline_mode<synchronous>, transform_indices = @transform_2, window_bounds = array<i64: 2, 128>}]} {
    %cst = arith.constant 0.000000e+00 : f32
    %0 = vector.broadcast %cst : f32 to vector<2x128xf32>
    %cst_0 = arith.constant 0.000000e+00 : f32
    %1 = vector.broadcast %cst_0 : f32 to vector<2x128xf32>
    %c0_i32 = arith.constant 0 : i32
    %2 = arith.index_cast %c0_i32 : i32 to index
    %c0 = arith.constant 0 : index
    %c0_1 = arith.constant 0 : index
    %3 = vector.load %arg1[%2, %c0, %c0_1] : memref<8x2x512xf32, #tpu.memory_space<vmem>>, vector<1x2x512xf32>
    %4 = vector.shape_cast %3 : vector<1x2x512xf32> to vector<2x512xf32>
    %5 = arith.truncf %0 : vector<2x128xf32> to vector<2x128xbf16>
    %c0_2 = arith.constant 0 : index
    %c0_3 = arith.constant 0 : index
    %6 = vector.load %arg2[%c0_2, %c0_3] : memref<128x512xbf16, #tpu.memory_space<vmem>>, vector<128x512xbf16>
    %cst_4 = arith.constant dense<0.000000e+00> : vector<2x512xf32>
    %7 = tpu.matmul %5, %6, %cst_4 {dimension_numbers = #tpu.dot_dimension_numbers<[1], [0], [0], [1], [0, 0, 1, 1], [], []>} : vector<2x128xbf16>, vector<128x512xbf16>, vector<2x512xf32> -> vector<2x512xf32>
    %8 = arith.addf %4, %7 : vector<2x512xf32>
    %9 = vector.extract_strided_slice %8 {offsets = [0, 0], sizes = [2, 128], strides = [1, 1]} : vector<2x512xf32> to vector<2x128xf32>
    %10 = arith.negf %9 : vector<2x128xf32>
    %11 = math.exp %10 : vector<2x128xf32>
    %cst_5 = arith.constant 1.000000e+00 : f32
    %12 = vector.broadcast %cst_5 : f32 to vector<2x128xf32>
    %13 = arith.addf %12, %11 : vector<2x128xf32>
    %14 = arith.divf %12, %13 : vector<2x128xf32>
    %15 = vector.extract_strided_slice %8 {offsets = [0, 128], sizes = [2, 128], strides = [1, 1]} : vector<2x512xf32> to vector<2x128xf32>
    %16 = arith.negf %15 : vector<2x128xf32>
    %17 = math.exp %16 : vector<2x128xf32>
    %cst_6 = arith.constant 1.000000e+00 : f32
    %18 = vector.broadcast %cst_6 : f32 to vector<2x128xf32>
    %19 = arith.addf %18, %17 : vector<2x128xf32>
    %20 = arith.divf %18, %19 : vector<2x128xf32>
    %21 = vector.extract_strided_slice %8 {offsets = [0, 256], sizes = [2, 128], strides = [1, 1]} : vector<2x512xf32> to vector<2x128xf32>
    %22 = math.tanh %21 : vector<2x128xf32>
    %23 = vector.extract_strided_slice %8 {offsets = [0, 384], sizes = [2, 128], strides = [1, 1]} : vector<2x512xf32> to vector<2x128xf32>
    %24 = arith.negf %23 : vector<2x128xf32>
    %25 = math.exp %24 : vector<2x128xf32>
    %cst_7 = arith.constant 1.000000e+00 : f32
    %26 = vector.broadcast %cst_7 : f32 to vector<2x128xf32>
    %27 = arith.addf %26, %25 : vector<2x128xf32>
    %28 = arith.divf %26, %27 : vector<2x128xf32>
    %29 = arith.mulf %20, %1 : vector<2x128xf32>
    %30 = arith.mulf %14, %22 : vector<2x128xf32>
    %31 = arith.addf %29, %30 : vector<2x128xf32>
    %32 = math.tanh %31 : vector<2x128xf32>
    %33 = arith.mulf %28, %32 : vector<2x128xf32>
    %c1_i32 = arith.constant 1 : i32
    %34 = arith.index_cast %c1_i32 : i32 to index
    %c0_8 = arith.constant 0 : index
    %c0_9 = arith.constant 0 : index
    %35 = vector.load %arg1[%34, %c0_8, %c0_9] : memref<8x2x512xf32, #tpu.memory_space<vmem>>, vector<1x2x512xf32>
    %36 = vector.shape_cast %35 : vector<1x2x512xf32> to vector<2x512xf32>
    %37 = arith.truncf %33 : vector<2x128xf32> to vector<2x128xbf16>
    %c0_10 = arith.constant 0 : index
    %c0_11 = arith.constant 0 : index
    %38 = vector.load %arg2[%c0_10, %c0_11] : memref<128x512xbf16, #tpu.memory_space<vmem>>, vector<128x512xbf16>
    %cst_12 = arith.constant dense<0.000000e+00> : vector<2x512xf32>
    %39 = tpu.matmul %37, %38, %cst_12 {dimension_numbers = #tpu.dot_dimension_numbers<[1], [0], [0], [1], [0, 0, 1, 1], [], []>} : vector<2x128xbf16>, vector<128x512xbf16>, vector<2x512xf32> -> vector<2x512xf32>
    %40 = arith.addf %36, %39 : vector<2x512xf32>
    %41 = vector.extract_strided_slice %40 {offsets = [0, 0], sizes = [2, 128], strides = [1, 1]} : vector<2x512xf32> to vector<2x128xf32>
    %42 = arith.negf %41 : vector<2x128xf32>
    %43 = math.exp %42 : vector<2x128xf32>
    %cst_13 = arith.constant 1.000000e+00 : f32
    %44 = vector.broadcast %cst_13 : f32 to vector<2x128xf32>
    %45 = arith.addf %44, %43 : vector<2x128xf32>
    %46 = arith.divf %44, %45 : vector<2x128xf32>
    %47 = vector.extract_strided_slice %40 {offsets = [0, 128], sizes = [2, 128], strides = [1, 1]} : vector<2x512xf32> to vector<2x128xf32>
    %48 = arith.negf %47 : vector<2x128xf32>
    %49 = math.exp %48 : vector<2x128xf32>
    %cst_14 = arith.constant 1.000000e+00 : f32
    %50 = vector.broadcast %cst_14 : f32 to vector<2x128xf32>
    %51 = arith.addf %50, %49 : vector<2x128xf32>
    %52 = arith.divf %50, %51 : vector<2x128xf32>
    %53 = vector.extract_strided_slice %40 {offsets = [0, 256], sizes = [2, 128], strides = [1, 1]} : vector<2x512xf32> to vector<2x128xf32>
    %54 = math.tanh %53 : vector<2x128xf32>
    %55 = vector.extract_strided_slice %40 {offsets = [0, 384], sizes = [2, 128], strides = [1, 1]} : vector<2x512xf32> to vector<2x128xf32>
    %56 = arith.negf %55 : vector<2x128xf32>
    %57 = math.exp %56 : vector<2x128xf32>
    %cst_15 = arith.constant 1.000000e+00 : f32
    %58 = vector.broadcast %cst_15 : f32 to vector<2x128xf32>
    %59 = arith.addf %58, %57 : vector<2x128xf32>
    %60 = arith.divf %58, %59 : vector<2x128xf32>
    %61 = arith.mulf %52, %31 : vector<2x128xf32>
    %62 = arith.mulf %46, %54 : vector<2x128xf32>
    %63 = arith.addf %61, %62 : vector<2x128xf32>
    %64 = math.tanh %63 : vector<2x128xf32>
    %65 = arith.mulf %60, %64 : vector<2x128xf32>
    %c2_i32 = arith.constant 2 : i32
    %66 = arith.index_cast %c2_i32 : i32 to index
    %c0_16 = arith.constant 0 : index
    %c0_17 = arith.constant 0 : index
    %67 = vector.load %arg1[%66, %c0_16, %c0_17] : memref<8x2x512xf32, #tpu.memory_space<vmem>>, vector<1x2x512xf32>
    %68 = vector.shape_cast %67 : vector<1x2x512xf32> to vector<2x512xf32>
    %69 = arith.truncf %65 : vector<2x128xf32> to vector<2x128xbf16>
    %c0_18 = arith.constant 0 : index
    %c0_19 = arith.constant 0 : index
    %70 = vector.load %arg2[%c0_18, %c0_19] : memref<128x512xbf16, #tpu.memory_space<vmem>>, vector<128x512xbf16>
    %cst_20 = arith.constant dense<0.000000e+00> : vector<2x512xf32>
    %71 = tpu.matmul %69, %70, %cst_20 {dimension_numbers = #tpu.dot_dimension_numbers<[1], [0], [0], [1], [0, 0, 1, 1], [], []>} : vector<2x128xbf16>, vector<128x512xbf16>, vector<2x512xf32> -> vector<2x512xf32>
    %72 = arith.addf %68, %71 : vector<2x512xf32>
    %73 = vector.extract_strided_slice %72 {offsets = [0, 0], sizes = [2, 128], strides = [1, 1]} : vector<2x512xf32> to vector<2x128xf32>
    %74 = arith.negf %73 : vector<2x128xf32>
    %75 = math.exp %74 : vector<2x128xf32>
    %cst_21 = arith.constant 1.000000e+00 : f32
    %76 = vector.broadcast %cst_21 : f32 to vector<2x128xf32>
    %77 = arith.addf %76, %75 : vector<2x128xf32>
    %78 = arith.divf %76, %77 : vector<2x128xf32>
    %79 = vector.extract_strided_slice %72 {offsets = [0, 128], sizes = [2, 128], strides = [1, 1]} : vector<2x512xf32> to vector<2x128xf32>
    %80 = arith.negf %79 : vector<2x128xf32>
    %81 = math.exp %80 : vector<2x128xf32>
    %cst_22 = arith.constant 1.000000e+00 : f32
    %82 = vector.broadcast %cst_22 : f32 to vector<2x128xf32>
    %83 = arith.addf %82, %81 : vector<2x128xf32>
    %84 = arith.divf %82, %83 : vector<2x128xf32>
    %85 = vector.extract_strided_slice %72 {offsets = [0, 256], sizes = [2, 128], strides = [1, 1]} : vector<2x512xf32> to vector<2x128xf32>
    %86 = math.tanh %85 : vector<2x128xf32>
    %87 = vector.extract_strided_slice %72 {offsets = [0, 384], sizes = [2, 128], strides = [1, 1]} : vector<2x512xf32> to vector<2x128xf32>
    %88 = arith.negf %87 : vector<2x128xf32>
    %89 = math.exp %88 : vector<2x128xf32>
    %cst_23 = arith.constant 1.000000e+00 : f32
    %90 = vector.broadcast %cst_23 : f32 to vector<2x128xf32>
    %91 = arith.addf %90, %89 : vector<2x128xf32>
    %92 = arith.divf %90, %91 : vector<2x128xf32>
    %93 = arith.mulf %84, %63 : vector<2x128xf32>
    %94 = arith.mulf %78, %86 : vector<2x128xf32>
    %95 = arith.addf %93, %94 : vector<2x128xf32>
    %96 = math.tanh %95 : vector<2x128xf32>
    %97 = arith.mulf %92, %96 : vector<2x128xf32>
    %c3_i32 = arith.constant 3 : i32
    %98 = arith.index_cast %c3_i32 : i32 to index
    %c0_24 = arith.constant 0 : index
    %c0_25 = arith.constant 0 : index
    %99 = vector.load %arg1[%98, %c0_24, %c0_25] : memref<8x2x512xf32, #tpu.memory_space<vmem>>, vector<1x2x512xf32>
    %100 = vector.shape_cast %99 : vector<1x2x512xf32> to vector<2x512xf32>
    %101 = arith.truncf %97 : vector<2x128xf32> to vector<2x128xbf16>
    %c0_26 = arith.constant 0 : index
    %c0_27 = arith.constant 0 : index
    %102 = vector.load %arg2[%c0_26, %c0_27] : memref<128x512xbf16, #tpu.memory_space<vmem>>, vector<128x512xbf16>
    %cst_28 = arith.constant dense<0.000000e+00> : vector<2x512xf32>
    %103 = tpu.matmul %101, %102, %cst_28 {dimension_numbers = #tpu.dot_dimension_numbers<[1], [0], [0], [1], [0, 0, 1, 1], [], []>} : vector<2x128xbf16>, vector<128x512xbf16>, vector<2x512xf32> -> vector<2x512xf32>
    %104 = arith.addf %100, %103 : vector<2x512xf32>
    %105 = vector.extract_strided_slice %104 {offsets = [0, 0], sizes = [2, 128], strides = [1, 1]} : vector<2x512xf32> to vector<2x128xf32>
    %106 = arith.negf %105 : vector<2x128xf32>
    %107 = math.exp %106 : vector<2x128xf32>
    %cst_29 = arith.constant 1.000000e+00 : f32
    %108 = vector.broadcast %cst_29 : f32 to vector<2x128xf32>
    %109 = arith.addf %108, %107 : vector<2x128xf32>
    %110 = arith.divf %108, %109 : vector<2x128xf32>
    %111 = vector.extract_strided_slice %104 {offsets = [0, 128], sizes = [2, 128], strides = [1, 1]} : vector<2x512xf32> to vector<2x128xf32>
    %112 = arith.negf %111 : vector<2x128xf32>
    %113 = math.exp %112 : vector<2x128xf32>
    %cst_30 = arith.constant 1.000000e+00 : f32
    %114 = vector.broadcast %cst_30 : f32 to vector<2x128xf32>
    %115 = arith.addf %114, %113 : vector<2x128xf32>
    %116 = arith.divf %114, %115 : vector<2x128xf32>
    %117 = vector.extract_strided_slice %104 {offsets = [0, 256], sizes = [2, 128], strides = [1, 1]} : vector<2x512xf32> to vector<2x128xf32>
    %118 = math.tanh %117 : vector<2x128xf32>
    %119 = vector.extract_strided_slice %104 {offsets = [0, 384], sizes = [2, 128], strides = [1, 1]} : vector<2x512xf32> to vector<2x128xf32>
    %120 = arith.negf %119 : vector<2x128xf32>
    %121 = math.exp %120 : vector<2x128xf32>
    %cst_31 = arith.constant 1.000000e+00 : f32
    %122 = vector.broadcast %cst_31 : f32 to vector<2x128xf32>
    %123 = arith.addf %122, %121 : vector<2x128xf32>
    %124 = arith.divf %122, %123 : vector<2x128xf32>
    %125 = arith.mulf %116, %95 : vector<2x128xf32>
    %126 = arith.mulf %110, %118 : vector<2x128xf32>
    %127 = arith.addf %125, %126 : vector<2x128xf32>
    %128 = math.tanh %127 : vector<2x128xf32>
    %129 = arith.mulf %124, %128 : vector<2x128xf32>
    %c4_i32 = arith.constant 4 : i32
    %130 = arith.index_cast %c4_i32 : i32 to index
    %c0_32 = arith.constant 0 : index
    %c0_33 = arith.constant 0 : index
    %131 = vector.load %arg1[%130, %c0_32, %c0_33] : memref<8x2x512xf32, #tpu.memory_space<vmem>>, vector<1x2x512xf32>
    %132 = vector.shape_cast %131 : vector<1x2x512xf32> to vector<2x512xf32>
    %133 = arith.truncf %129 : vector<2x128xf32> to vector<2x128xbf16>
    %c0_34 = arith.constant 0 : index
    %c0_35 = arith.constant 0 : index
    %134 = vector.load %arg2[%c0_34, %c0_35] : memref<128x512xbf16, #tpu.memory_space<vmem>>, vector<128x512xbf16>
    %cst_36 = arith.constant dense<0.000000e+00> : vector<2x512xf32>
    %135 = tpu.matmul %133, %134, %cst_36 {dimension_numbers = #tpu.dot_dimension_numbers<[1], [0], [0], [1], [0, 0, 1, 1], [], []>} : vector<2x128xbf16>, vector<128x512xbf16>, vector<2x512xf32> -> vector<2x512xf32>
    %136 = arith.addf %132, %135 : vector<2x512xf32>
    %137 = vector.extract_strided_slice %136 {offsets = [0, 0], sizes = [2, 128], strides = [1, 1]} : vector<2x512xf32> to vector<2x128xf32>
    %138 = arith.negf %137 : vector<2x128xf32>
    %139 = math.exp %138 : vector<2x128xf32>
    %cst_37 = arith.constant 1.000000e+00 : f32
    %140 = vector.broadcast %cst_37 : f32 to vector<2x128xf32>
    %141 = arith.addf %140, %139 : vector<2x128xf32>
    %142 = arith.divf %140, %141 : vector<2x128xf32>
    %143 = vector.extract_strided_slice %136 {offsets = [0, 128], sizes = [2, 128], strides = [1, 1]} : vector<2x512xf32> to vector<2x128xf32>
    %144 = arith.negf %143 : vector<2x128xf32>
    %145 = math.exp %144 : vector<2x128xf32>
    %cst_38 = arith.constant 1.000000e+00 : f32
    %146 = vector.broadcast %cst_38 : f32 to vector<2x128xf32>
    %147 = arith.addf %146, %145 : vector<2x128xf32>
    %148 = arith.divf %146, %147 : vector<2x128xf32>
    %149 = vector.extract_strided_slice %136 {offsets = [0, 256], sizes = [2, 128], strides = [1, 1]} : vector<2x512xf32> to vector<2x128xf32>
    %150 = math.tanh %149 : vector<2x128xf32>
    %151 = vector.extract_strided_slice %136 {offsets = [0, 384], sizes = [2, 128], strides = [1, 1]} : vector<2x512xf32> to vector<2x128xf32>
    %152 = arith.negf %151 : vector<2x128xf32>
    %153 = math.exp %152 : vector<2x128xf32>
    %cst_39 = arith.constant 1.000000e+00 : f32
    %154 = vector.broadcast %cst_39 : f32 to vector<2x128xf32>
    %155 = arith.addf %154, %153 : vector<2x128xf32>
    %156 = arith.divf %154, %155 : vector<2x128xf32>
    %157 = arith.mulf %148, %127 : vector<2x128xf32>
    %158 = arith.mulf %142, %150 : vector<2x128xf32>
    %159 = arith.addf %157, %158 : vector<2x128xf32>
    %160 = math.tanh %159 : vector<2x128xf32>
    %161 = arith.mulf %156, %160 : vector<2x128xf32>
    %c5_i32 = arith.constant 5 : i32
    %162 = arith.index_cast %c5_i32 : i32 to index
    %c0_40 = arith.constant 0 : index
    %c0_41 = arith.constant 0 : index
    %163 = vector.load %arg1[%162, %c0_40, %c0_41] : memref<8x2x512xf32, #tpu.memory_space<vmem>>, vector<1x2x512xf32>
    %164 = vector.shape_cast %163 : vector<1x2x512xf32> to vector<2x512xf32>
    %165 = arith.truncf %161 : vector<2x128xf32> to vector<2x128xbf16>
    %c0_42 = arith.constant 0 : index
    %c0_43 = arith.constant 0 : index
    %166 = vector.load %arg2[%c0_42, %c0_43] : memref<128x512xbf16, #tpu.memory_space<vmem>>, vector<128x512xbf16>
    %cst_44 = arith.constant dense<0.000000e+00> : vector<2x512xf32>
    %167 = tpu.matmul %165, %166, %cst_44 {dimension_numbers = #tpu.dot_dimension_numbers<[1], [0], [0], [1], [0, 0, 1, 1], [], []>} : vector<2x128xbf16>, vector<128x512xbf16>, vector<2x512xf32> -> vector<2x512xf32>
    %168 = arith.addf %164, %167 : vector<2x512xf32>
    %169 = vector.extract_strided_slice %168 {offsets = [0, 0], sizes = [2, 128], strides = [1, 1]} : vector<2x512xf32> to vector<2x128xf32>
    %170 = arith.negf %169 : vector<2x128xf32>
    %171 = math.exp %170 : vector<2x128xf32>
    %cst_45 = arith.constant 1.000000e+00 : f32
    %172 = vector.broadcast %cst_45 : f32 to vector<2x128xf32>
    %173 = arith.addf %172, %171 : vector<2x128xf32>
    %174 = arith.divf %172, %173 : vector<2x128xf32>
    %175 = vector.extract_strided_slice %168 {offsets = [0, 128], sizes = [2, 128], strides = [1, 1]} : vector<2x512xf32> to vector<2x128xf32>
    %176 = arith.negf %175 : vector<2x128xf32>
    %177 = math.exp %176 : vector<2x128xf32>
    %cst_46 = arith.constant 1.000000e+00 : f32
    %178 = vector.broadcast %cst_46 : f32 to vector<2x128xf32>
    %179 = arith.addf %178, %177 : vector<2x128xf32>
    %180 = arith.divf %178, %179 : vector<2x128xf32>
    %181 = vector.extract_strided_slice %168 {offsets = [0, 256], sizes = [2, 128], strides = [1, 1]} : vector<2x512xf32> to vector<2x128xf32>
    %182 = math.tanh %181 : vector<2x128xf32>
    %183 = vector.extract_strided_slice %168 {offsets = [0, 384], sizes = [2, 128], strides = [1, 1]} : vector<2x512xf32> to vector<2x128xf32>
    %184 = arith.negf %183 : vector<2x128xf32>
    %185 = math.exp %184 : vector<2x128xf32>
    %cst_47 = arith.constant 1.000000e+00 : f32
    %186 = vector.broadcast %cst_47 : f32 to vector<2x128xf32>
    %187 = arith.addf %186, %185 : vector<2x128xf32>
    %188 = arith.divf %186, %187 : vector<2x128xf32>
    %189 = arith.mulf %180, %159 : vector<2x128xf32>
    %190 = arith.mulf %174, %182 : vector<2x128xf32>
    %191 = arith.addf %189, %190 : vector<2x128xf32>
    %192 = math.tanh %191 : vector<2x128xf32>
    %193 = arith.mulf %188, %192 : vector<2x128xf32>
    %c6_i32 = arith.constant 6 : i32
    %194 = arith.index_cast %c6_i32 : i32 to index
    %c0_48 = arith.constant 0 : index
    %c0_49 = arith.constant 0 : index
    %195 = vector.load %arg1[%194, %c0_48, %c0_49] : memref<8x2x512xf32, #tpu.memory_space<vmem>>, vector<1x2x512xf32>
    %196 = vector.shape_cast %195 : vector<1x2x512xf32> to vector<2x512xf32>
    %197 = arith.truncf %193 : vector<2x128xf32> to vector<2x128xbf16>
    %c0_50 = arith.constant 0 : index
    %c0_51 = arith.constant 0 : index
    %198 = vector.load %arg2[%c0_50, %c0_51] : memref<128x512xbf16, #tpu.memory_space<vmem>>, vector<128x512xbf16>
    %cst_52 = arith.constant dense<0.000000e+00> : vector<2x512xf32>
    %199 = tpu.matmul %197, %198, %cst_52 {dimension_numbers = #tpu.dot_dimension_numbers<[1], [0], [0], [1], [0, 0, 1, 1], [], []>} : vector<2x128xbf16>, vector<128x512xbf16>, vector<2x512xf32> -> vector<2x512xf32>
    %200 = arith.addf %196, %199 : vector<2x512xf32>
    %201 = vector.extract_strided_slice %200 {offsets = [0, 0], sizes = [2, 128], strides = [1, 1]} : vector<2x512xf32> to vector<2x128xf32>
    %202 = arith.negf %201 : vector<2x128xf32>
    %203 = math.exp %202 : vector<2x128xf32>
    %cst_53 = arith.constant 1.000000e+00 : f32
    %204 = vector.broadcast %cst_53 : f32 to vector<2x128xf32>
    %205 = arith.addf %204, %203 : vector<2x128xf32>
    %206 = arith.divf %204, %205 : vector<2x128xf32>
    %207 = vector.extract_strided_slice %200 {offsets = [0, 128], sizes = [2, 128], strides = [1, 1]} : vector<2x512xf32> to vector<2x128xf32>
    %208 = arith.negf %207 : vector<2x128xf32>
    %209 = math.exp %208 : vector<2x128xf32>
    %cst_54 = arith.constant 1.000000e+00 : f32
    %210 = vector.broadcast %cst_54 : f32 to vector<2x128xf32>
    %211 = arith.addf %210, %209 : vector<2x128xf32>
    %212 = arith.divf %210, %211 : vector<2x128xf32>
    %213 = vector.extract_strided_slice %200 {offsets = [0, 256], sizes = [2, 128], strides = [1, 1]} : vector<2x512xf32> to vector<2x128xf32>
    %214 = math.tanh %213 : vector<2x128xf32>
    %215 = vector.extract_strided_slice %200 {offsets = [0, 384], sizes = [2, 128], strides = [1, 1]} : vector<2x512xf32> to vector<2x128xf32>
    %216 = arith.negf %215 : vector<2x128xf32>
    %217 = math.exp %216 : vector<2x128xf32>
    %cst_55 = arith.constant 1.000000e+00 : f32
    %218 = vector.broadcast %cst_55 : f32 to vector<2x128xf32>
    %219 = arith.addf %218, %217 : vector<2x128xf32>
    %220 = arith.divf %218, %219 : vector<2x128xf32>
    %221 = arith.mulf %212, %191 : vector<2x128xf32>
    %222 = arith.mulf %206, %214 : vector<2x128xf32>
    %223 = arith.addf %221, %222 : vector<2x128xf32>
    %224 = math.tanh %223 : vector<2x128xf32>
    %225 = arith.mulf %220, %224 : vector<2x128xf32>
    %c7_i32 = arith.constant 7 : i32
    %226 = arith.index_cast %c7_i32 : i32 to index
    %c0_56 = arith.constant 0 : index
    %c0_57 = arith.constant 0 : index
    %227 = vector.load %arg1[%226, %c0_56, %c0_57] : memref<8x2x512xf32, #tpu.memory_space<vmem>>, vector<1x2x512xf32>
    %228 = vector.shape_cast %227 : vector<1x2x512xf32> to vector<2x512xf32>
    %229 = arith.truncf %225 : vector<2x128xf32> to vector<2x128xbf16>
    %c0_58 = arith.constant 0 : index
    %c0_59 = arith.constant 0 : index
    %230 = vector.load %arg2[%c0_58, %c0_59] : memref<128x512xbf16, #tpu.memory_space<vmem>>, vector<128x512xbf16>
    %cst_60 = arith.constant dense<0.000000e+00> : vector<2x512xf32>
    %231 = tpu.matmul %229, %230, %cst_60 {dimension_numbers = #tpu.dot_dimension_numbers<[1], [0], [0], [1], [0, 0, 1, 1], [], []>} : vector<2x128xbf16>, vector<128x512xbf16>, vector<2x512xf32> -> vector<2x512xf32>
    %232 = arith.addf %228, %231 : vector<2x512xf32>
    %233 = vector.extract_strided_slice %232 {offsets = [0, 0], sizes = [2, 128], strides = [1, 1]} : vector<2x512xf32> to vector<2x128xf32>
    %234 = arith.negf %233 : vector<2x128xf32>
    %235 = math.exp %234 : vector<2x128xf32>
    %cst_61 = arith.constant 1.000000e+00 : f32
    %236 = vector.broadcast %cst_61 : f32 to vector<2x128xf32>
    %237 = arith.addf %236, %235 : vector<2x128xf32>
    %238 = arith.divf %236, %237 : vector<2x128xf32>
    %239 = vector.extract_strided_slice %232 {offsets = [0, 128], sizes = [2, 128], strides = [1, 1]} : vector<2x512xf32> to vector<2x128xf32>
    %240 = arith.negf %239 : vector<2x128xf32>
    %241 = math.exp %240 : vector<2x128xf32>
    %cst_62 = arith.constant 1.000000e+00 : f32
    %242 = vector.broadcast %cst_62 : f32 to vector<2x128xf32>
    %243 = arith.addf %242, %241 : vector<2x128xf32>
    %244 = arith.divf %242, %243 : vector<2x128xf32>
    %245 = vector.extract_strided_slice %232 {offsets = [0, 256], sizes = [2, 128], strides = [1, 1]} : vector<2x512xf32> to vector<2x128xf32>
    %246 = math.tanh %245 : vector<2x128xf32>
    %247 = vector.extract_strided_slice %232 {offsets = [0, 384], sizes = [2, 128], strides = [1, 1]} : vector<2x512xf32> to vector<2x128xf32>
    %248 = arith.negf %247 : vector<2x128xf32>
    %249 = math.exp %248 : vector<2x128xf32>
    %cst_63 = arith.constant 1.000000e+00 : f32
    %250 = vector.broadcast %cst_63 : f32 to vector<2x128xf32>
    %251 = arith.addf %250, %249 : vector<2x128xf32>
    %252 = arith.divf %250, %251 : vector<2x128xf32>
    %253 = arith.mulf %244, %223 : vector<2x128xf32>
    %254 = arith.mulf %238, %246 : vector<2x128xf32>
    %255 = arith.addf %253, %254 : vector<2x128xf32>
    %256 = math.tanh %255 : vector<2x128xf32>
    %257 = arith.mulf %252, %256 : vector<2x128xf32>
    %c8_i32 = arith.constant 8 : i32
    %c0_64 = arith.constant 0 : index
    %c0_65 = arith.constant 0 : index
    %258 = vector.load %arg3[%c0_64, %c0_65] : memref<2x128xf32, #tpu.memory_space<vmem>>, vector<2x128xf32>
    tpu.vector_store %arg3[%c0_64, %c0_65], %257 {strides = array<i32>} : memref<2x128xf32, #tpu.memory_space<vmem>>, vector<2x128xf32>,
    return
  }
  func.func @transform_0(%arg0: i32) -> (i32, i32, i32) {
    %c0_i32 = arith.constant 0 : i32
    %c0_i32_0 = arith.constant 0 : i32
    %c0_i32_1 = arith.constant 0 : i32
    %c0_i32_2 = arith.constant 0 : i32
    return %c0_i32, %c0_i32_0, %c0_i32_1 : i32, i32, i32
  }
  func.func @transform_1(%arg0: i32) -> (i32, i32) {
    %c0_i32 = arith.constant 0 : i32
    %c0_i32_0 = arith.constant 0 : i32
    %c0_i32_1 = arith.constant 0 : i32
    return %c0_i32, %c0_i32_0 : i32, i32
  }
  func.func @transform_2(%arg0: i32) -> (i32, i32) {
    %c0_i32 = arith.constant 0 : i32
    %c0_i32_0 = arith.constant 0 : i32
    %c0_i32_1 = arith.constant 0 : i32
    return %c0_i32, %c0_i32_0 : i32, i32
  }
}

</mosaic_0001>

<bundles_post_ra>
// kernel: tpu_custom_call.1
= control target key start
LH: loop header
LB: loop body
LE: loop exit
PB: predicated region body
PF: predicated region fallthrough
CT: control target
= control target key end

     0   :  { %7 = vsyncpa [#allocation3], 0  ;;  %s2113_s0 = inlined_call_operand.hbm [shape: f32[8,2,512], index: 0, kind: input, shape index: {}]   ;;  %s2114_s1 = inlined_call_operand.hbm [shape: bf16[128,512], index: 1, kind: input, shape index: {}]   ;;  %s2115_s2 = inlined_call_operand.hbm [shape: f32[2,128], index: 2, kind: output, shape index: {}]  }
   0x1   :  { %8 = vsyncpa [#allocation6], 0 }
   0x2   :  { %9 = vsyncpa [#allocation4], 0  ;;  %s1705_s9 = smov [#allocation2]   ;;  %s1633_s13 = scalar_lea.hbm %s2113_s0, 1024 }
   0x3   :  { %s15_s10 = sshll.u32 %s1705_s9, 4  ;;  %p1634_p0 = scmp.ne.s32.totalorder %s2113_s0, %s1633_s13  ;;  %s16_s10 = int_to_ptr.vmem [resolvable:$true] %s15_s10 }
   0x4   :  { %p1637_p1 = scmp.lt.u32.totalorder %s1633_s13, %s2113_s0 }
   0x6   :  { %p1639_p2 = pnand %p1637_p1, %p1634_p0 }
   0x8   :  { %1642 = shalt.err (!%p1639_p2)
}
   0x9   :  { %s1643_s18 = scalar_lea.vmem %s16_s10, 1024  ;;  %p1648_p4 = scmp.lt.s32.totalorder %s16_s10, %s16_s10 }
   0xa   :  { %p1644_p3 = scmp.ne.s32.totalorder %s16_s10, %s1643_s18  ;;  %p1649_p5 = scmp.lt.s32.totalorder %s1643_s18, %s1643_s18 }
   0xc   :  { %p1650_p6 = por %p1649_p5, %p1648_p4 }
   0xe   :  { %p1651_p7 = pnand %p1650_p6, %p1644_p3 }
  0x10   :  { %1654 = shalt.err (!%p1651_p7)
}
  0x11   :  { %s1706_s19 = smov 128   ;;  %s1707_s20 = smov 8  }
  0x12   :  { %21 = dma.hbm_to_vmem [thread:$0]  %s2113_s0, 1024, %s16_s10, [#allocation3], %s1706_s19, %s1706_s19, %s1707_s20  }
  0x13   :  { %s1708_s23 = smov [#allocation5]   ;;  %s1655_s27 = scalar_lea.hbm %s2114_s1, 4096 }
  0x14   :  { %s27_s24 = sshll.u32 %s1708_s23, 4  ;;  %p1656_p8 = scmp.ne.s32.totalorder %s2114_s1, %s1655_s27  ;;  %s28_s24 = int_to_ptr.vmem [resolvable:$true] %s27_s24 }
  0x15   :  { %p1659_p9 = scmp.lt.u32.totalorder %s1655_s27, %s2114_s1 }
  0x17   :  { %p1661_p10 = pnand %p1659_p9, %p1656_p8 }
  0x19   :  { %1664 = shalt.err (!%p1661_p10)
}
  0x1a   :  { %s1665_s4 = scalar_lea.vmem %s28_s24, 4096  ;;  %p1670_p12 = scmp.lt.s32.totalorder %s28_s24, %s28_s24 }
  0x1b   :  { %p1666_p11 = scmp.ne.s32.totalorder %s28_s24, %s1665_s4  ;;  %p1671_p13 = scmp.lt.s32.totalorder %s1665_s4, %s1665_s4 }
  0x1d   :  { %p1672_p0 = por %p1671_p13, %p1670_p12 }
  0x1f   :  { %p1673_p1 = pnand %p1672_p0, %p1666_p11 }
  0x21   :  { %1676 = shalt.err (!%p1673_p1)
}
  0x22   :  { %s1709_s0 = smov 256   ;;  %s1710_s5 = smov 16  }
  0x23   :  { %33 = dma.hbm_to_vmem [thread:$0]  %s2114_s1, 4096, %s28_s24, [#allocation6], %s1709_s0, %s1709_s0, %s1710_s5  }
  0x24   :  { %1699 = dma.done.wait [#allocation3], 1024  }
  0x25   :  { %1700 = vsyncadd [#allocation3], 4294966272 }
  0x26   :  { %1701 = dma.done.wait [#allocation6], 4096  }
  0x27   :  { %1702 = vsyncadd [#allocation6], 4294963200  ;;  %v1711_v0 = vmov 0   ;;  %v1755_v1 = vld [vmem:[#allocation5 + $0x4] ss:$16 sps:$4 sm:$0xff]   ;;  %v325_v35 = vlaneseq  ;;  %s1713_s1 = smov [#allocation7]  }
  0x28   :  { %266 = vmatprep.mubr.bf16.mxu0 %v1711_v0  ;;  %307 = vmatprep.mubr.bf16.mxu1 %v1711_v0  ;;  %v1757_v2 = vld [vmem:[#allocation5 + $0xc] ss:$16 sps:$4 sm:$0xff]   ;;  %v1760_v3 = vld [vmem:[#allocation5] ss:$16 sps:$4 sm:$0xff]   ;;  %v1762_v4 = vld [vmem:[#allocation5 + $0x8] ss:$16 sps:$4 sm:$0xff]  }
  0x29   :  { %234 = vmatprep.subr.bf16.mxu0 %v1755_v1  ;;  %275 = vmatprep.subr.bf16.mxu1 %v1757_v2  ;;  %v1765_v5 = vld [vmem:[#allocation5 + $0x24] ss:$16 sps:$4 sm:$0xff]   ;;  %v1769_v6 = vld [vmem:[#allocation5 + $0x2c] ss:$16 sps:$4 sm:$0xff]   ;;  %v1771_v7 = vld [vmem:[#allocation5 + $0x20] ss:$16 sps:$4 sm:$0xff]  }
  0x2a   :  { %235 = vmatpush1.bf16.msra.mxu0 %v1760_v3  ;;  %276 = vmatpush1.bf16.msra.mxu1 %v1762_v4  ;;  %v1774_v8 = vld [vmem:[#allocation5 + $0x28] ss:$16 sps:$4 sm:$0xff]   ;;  %v1777_v9 = vld [vmem:[#allocation5 + $0x44] ss:$16 sps:$4 sm:$0xff]   ;;  %v1779_v10 = vld [vmem:[#allocation5 + $0x4c] ss:$16 sps:$4 sm:$0xff]  }
  0x2b   :  { %236 = vmatprep.subr.bf16.mxu0 %v1765_v5  ;;  %277 = vmatprep.subr.bf16.mxu1 %v1769_v6  ;;  %v1781_v11 = vld [vmem:[#allocation5 + $0x40] ss:$16 sps:$4 sm:$0xff]   ;;  %v1783_v12 = vld [vmem:[#allocation5 + $0x48] ss:$16 sps:$4 sm:$0xff]   ;;  %v1787_v13 = vld [vmem:[#allocation5 + $0x64] ss:$16 sps:$4 sm:$0xff]  }
  0x2c   :  { %v1791_v14 = vld [vmem:[#allocation5 + $0x6c] ss:$16 sps:$4 sm:$0xff]   ;;  %v1793_v15 = vld [vmem:[#allocation5 + $0x60] ss:$16 sps:$4 sm:$0xff]   ;;  %v1797_v16 = vld [vmem:[#allocation5 + $0x68] ss:$16 sps:$4 sm:$0xff]  }
  0x2d   :  { %v1799_v17 = vld [vmem:[#allocation5 + $0x84] ss:$16 sps:$4 sm:$0xff]   ;;  %v1803_v18 = vld [vmem:[#allocation5 + $0x8c] ss:$16 sps:$4 sm:$0xff]   ;;  %v1805_v19 = vld [vmem:[#allocation5 + $0x80] ss:$16 sps:$4 sm:$0xff]  }
  0x2e   :  { %237 = vmatpush1.bf16.msra.mxu0 %v1771_v7  ;;  %278 = vmatpush1.bf16.msra.mxu1 %v1774_v8  ;;  %v1807_v20 = vld [vmem:[#allocation5 + $0x88] ss:$16 sps:$4 sm:$0xff]   ;;  %v1811_v21 = vld [vmem:[#allocation5 + $0xa4] ss:$16 sps:$4 sm:$0xff]   ;;  %v1815_v22 = vld [vmem:[#allocation5 + $0xac] ss:$16 sps:$4 sm:$0xff]  }
  0x2f   :  { %238 = vmatprep.subr.bf16.mxu0 %v1777_v9  ;;  %279 = vmatprep.subr.bf16.mxu1 %v1779_v10  ;;  %v1819_v23 = vld [vmem:[#allocation5 + $0xa0] ss:$16 sps:$4 sm:$0xff]   ;;  %v1821_v24 = vld [vmem:[#allocation5 + $0xa8] ss:$16 sps:$4 sm:$0xff]   ;;  %v1825_v25 = vld [vmem:[#allocation5 + $0xc4] ss:$16 sps:$4 sm:$0xff]  }
  0x30   :  { %v1827_v26 = vld [vmem:[#allocation5 + $0xcc] ss:$16 sps:$4 sm:$0xff]   ;;  %v1831_v27 = vld [vmem:[#allocation5 + $0xc0] ss:$16 sps:$4 sm:$0xff]   ;;  %v1833_v28 = vld [vmem:[#allocation5 + $0xc8] ss:$16 sps:$4 sm:$0xff]  }
  0x31   :  { %v1837_v29 = vld [vmem:[#allocation5 + $0xe4] ss:$16 sps:$4 sm:$0xff]   ;;  %v1839_v30 = vld [vmem:[#allocation5 + $0xec] ss:$16 sps:$4 sm:$0xff]   ;;  %v1843_v31 = vld [vmem:[#allocation5 + $0xe0] ss:$16 sps:$4 sm:$0xff]  }
  0x32   :  { %239 = vmatpush1.bf16.msra.mxu0 %v1781_v11  ;;  %280 = vmatpush1.bf16.msra.mxu1 %v1783_v12  ;;  %v1845_v32 = vld [vmem:[#allocation5 + $0xe8] ss:$16 sps:$4 sm:$0xff]   ;;  %v1712_v33 = vmov 1983009808   ;;  %v326_v37 = vshrl.u32 %v325_v35, 7  ;;  %v41_v51 = vld [vmem:[#allocation2] sm:$0xff] }
  0x33   :  { %240 = vmatprep.subr.bf16.mxu0 %v1787_v13  ;;  %281 = vmatprep.subr.bf16.mxu1 %v1791_v14  ;;  %v323_v34 = vunpack.c.l.s4 %v1712_v33  ;;  %s1350_s8 = sshll.u32 %s1713_s1, 4  ;;  %s1351_s8 = int_to_ptr.vmem [resolvable:$true] %s1350_s8 }
  0x34   :  { %s1677_s9 = scalar_lea.vmem %s1351_s8, 32  ;;  %p1682_p3 = scmp.lt.s32.totalorder %s1351_s8, %s1351_s8 }
  0x35   :  { %v324_v36 = vunpack.c.0.s8 %v323_v34  ;;  %p1678_p2 = scmp.ne.s32.totalorder %s1351_s8, %s1677_s9  ;;  %p1683_p4 = scmp.lt.s32.totalorder %s1677_s9, %s1677_s9 }
  0x36   :  { %241 = vmatpush1.bf16.msra.mxu0 %v1793_v15  ;;  %282 = vmatpush1.bf16.msra.mxu1 %v1797_v16 }
  0x37   :  { %242 = vmatprep.subr.bf16.mxu0 %v1799_v17  ;;  %283 = vmatprep.subr.bf16.mxu1 %v1803_v18  ;;  %v1889_v40 = vsub.s32 %v324_v36, %v326_v37  ;;  %p1684_p5 = por %p1683_p4, %p1682_p3 }
  0x39   :  { %p1685_p6 = pnand %p1684_p5, %p1678_p2 }
  0x3a   :  { %243 = vmatpush1.bf16.msra.mxu0 %v1805_v19  ;;  %284 = vmatpush1.bf16.msra.mxu1 %v1807_v20 }
  0x3b   :  { %244 = vmatprep.subr.bf16.mxu0 %v1811_v21  ;;  %285 = vmatprep.subr.bf16.mxu1 %v1815_v22 }
  0x3e   :  { %245 = vmatpush1.bf16.msra.mxu0 %v1819_v23  ;;  %286 = vmatpush1.bf16.msra.mxu1 %v1821_v24 }
  0x3f   :  { %246 = vmatprep.subr.bf16.mxu0 %v1825_v25  ;;  %287 = vmatprep.subr.bf16.mxu1 %v1827_v26 }
  0x42   :  { %247 = vmatpush1.bf16.msra.mxu0 %v1831_v27  ;;  %288 = vmatpush1.bf16.msra.mxu1 %v1833_v28 }
  0x43   :  { %248 = vmatprep.subr.bf16.mxu0 %v1837_v29  ;;  %289 = vmatprep.subr.bf16.mxu1 %v1839_v30 }
  0x46   :  { %249 = vmatpush1.bf16.msra.mxu0 %v1843_v31  ;;  %290 = vmatpush1.bf16.msra.mxu1 %v1845_v32 }
  0x47   :  { %373 = vmatprep.subr.bf16.mxu0 %v1755_v1  ;;  %414 = vmatprep.subr.bf16.mxu1 %v1757_v2 }
  0x49   :  { %267 = vmatmul.mubr.bf16.vlgmr.msra.gmra.mrb[0].mxu0 %v1711_v0  ;;  %308 = vmatmul.mubr.bf16.vlgmr.msra.gmra.mrb[0].mxu1 %v1711_v0 }
  0x4a   :  { %374 = vmatpush1.bf16.msra.mxu0 %v1760_v3  ;;  %415 = vmatpush1.bf16.msra.mxu1 %v1762_v4 }
  0x4b   :  { %375 = vmatprep.subr.bf16.mxu0 %v1765_v5  ;;  %416 = vmatprep.subr.bf16.mxu1 %v1769_v6 }
  0x4c   :  { %405 = vmatprep.mubr.bf16.mxu0 %v1711_v0  ;;  %446 = vmatprep.mubr.bf16.mxu1 %v1711_v0 }
  0x4e   :  { %376 = vmatpush1.bf16.msra.mxu0 %v1771_v7  ;;  %417 = vmatpush1.bf16.msra.mxu1 %v1774_v8 }
  0x4f   :  { %377 = vmatprep.subr.bf16.mxu0 %v1777_v9  ;;  %418 = vmatprep.subr.bf16.mxu1 %v1779_v10 }
  0x52   :  { %378 = vmatpush1.bf16.msra.mxu0 %v1781_v11  ;;  %419 = vmatpush1.bf16.msra.mxu1 %v1783_v12 }
  0x53   :  { %379 = vmatprep.subr.bf16.mxu0 %v1787_v13  ;;  %420 = vmatprep.subr.bf16.mxu1 %v1791_v14 }
  0x56   :  { %380 = vmatpush1.bf16.msra.mxu0 %v1793_v15  ;;  %421 = vmatpush1.bf16.msra.mxu1 %v1797_v16 }
  0x57   :  { %381 = vmatprep.subr.bf16.mxu0 %v1799_v17  ;;  %422 = vmatprep.subr.bf16.mxu1 %v1803_v18 }
  0x5a   :  { %382 = vmatpush1.bf16.msra.mxu0 %v1805_v19  ;;  %423 = vmatpush1.bf16.msra.mxu1 %v1807_v20 }
  0x5b   :  { %383 = vmatprep.subr.bf16.mxu0 %v1811_v21  ;;  %424 = vmatprep.subr.bf16.mxu1 %v1815_v22 }
  0x5e   :  { %384 = vmatpush1.bf16.msra.mxu0 %v1819_v23  ;;  %425 = vmatpush1.bf16.msra.mxu1 %v1821_v24 }
  0x5f   :  { %385 = vmatprep.subr.bf16.mxu0 %v1825_v25  ;;  %426 = vmatprep.subr.bf16.mxu1 %v1827_v26 }
  0x62   :  { %386 = vmatpush1.bf16.msra.mxu0 %v1831_v27  ;;  %427 = vmatpush1.bf16.msra.mxu1 %v1833_v28 }
  0x63   :  { %387 = vmatprep.subr.bf16.mxu0 %v1837_v29  ;;  %428 = vmatprep.subr.bf16.mxu1 %v1839_v30 }
  0x66   :  { %388 = vmatpush1.bf16.msra.mxu0 %v1843_v31  ;;  %429 = vmatpush1.bf16.msra.mxu1 %v1845_v32 }
  0x67   :  { %512 = vmatprep.subr.bf16.mxu0 %v1755_v1  ;;  %553 = vmatprep.subr.bf16.mxu1 %v1757_v2 }
 0x11c   :  { %v268_v38 = vpop.f32.mrb[0].mxu0  ;;  %v309_v39 = vpop.f32.mrb[0].mxu1 }
 0x11d   :  { %v270_v41 = vpop.f32.mrb[1].mxu0  ;;  %v311_v42 = vpop.f32.mrb[1].mxu1 }
 0x11e   :  { %v320_v43 = vcombine.low %v268_v38, %v270_v41  ;;  %v321_v44 = vcombine.low %v309_v39, %v311_v42  ;;  %v272_v45 = vpop.f32.mrb[2].mxu0  ;;  %v313_v46 = vpop.f32.mrb[2].mxu1 }
 0x11f   :  { %v273_v47 = vpop.f32.mrb[3].mxu0  ;;  %v314_v48 = vpop.f32.mrb[3].mxu1 }
 0x120   :  { %v328_v49 = vrot.slane %v320_v43, %v1889_v40  ;;  %v335_v50 = vrot.slane %v321_v44, %v1889_v40 }
 0x122   :  { %v336_v52 = vcombine.low %v328_v49, %v335_v50 }
 0x124   :  { %v338_v53 = vadd.f32 %v336_v52, %v41_v51 }
 0x126   :  { %v1392_v54 = vmul.f32 -1.442695, %v338_v53  ;;  %v346_v55 = vrot.slane %v338_v53, 2  ;;  %v357_v57 = vrot.slane %v338_v53, 6  ;;  %v354_v60 = vrot.slane %v338_v53, 4 }
 0x128   :  { %1473 = vpow2.f32 %v1392_v54  ;;  %v1393_v56 = vmul.f32 -1.442695, %v346_v55  ;;  %v1394_v58 = vmul.f32 -1.442695, %v357_v57 }
 0x12a   :  { %1475 = vpow2.f32 %v1393_v56 }
 0x12b   :  { %1477 = vpow2.f32 %v1394_v58  ;;  %v371_v58 = vld [vmem:[#allocation2 + $0x8] sm:$0xff] }
 0x132   :  { %v1474_v59 = vpop.eup %1473 }
 0x133   :  { %v342_v61 = vadd.f32 1.0, %v1474_v59 }
 0x134   :  { %v1476_v62 = vpop.eup %1475 }
 0x135   :  { %1479 = vrcp.f32 %v342_v61  ;;  %v351_v63 = vadd.f32 1.0, %v1476_v62  ;;  %v1478_v33 = vpop.eup %1477 }
 0x136   :  { %1481 = vtanh.f32 %v354_v60  ;;  %v362_v37 = vadd.f32 1.0, %v1478_v33 }
 0x137   :  { %1483 = vrcp.f32 %v351_v63 }
 0x138   :  { %1485 = vrcp.f32 %v362_v37 }
 0x13f   :  { %v1480_v34 = vpop.eup %1479 }
 0x140   :  { %v1482_v35 = vpop.eup %1481 }
 0x141   :  { %v1484_v36 = vpop.eup %1483  ;;  %v366_v39 = vmul.f32 %v1482_v35, %v1480_v34 }
 0x142   :  { %v365_v38 = vmul.f32 0.0, %v1484_v36  ;;  %v1486_v42 = vpop.eup %1485 }
 0x144   :  { %v1893_v41 = vadd.f32 %v366_v39, %v365_v38 }
 0x146   :  { %1487 = vtanh.f32 %v1893_v41 }
 0x150   :  { %v1488_v43 = vpop.eup %1487 }
 0x151   :  { %v369_v44 = vmul.f32 %v1488_v43, %v1486_v42 }
 0x153   :  { %v372_v45 = vpack.c.bf16 %v369_v44, %v369_v44 }
 0x155   :  { %406 = vmatmul.mubr.bf16.vlgmr.msra.gmra.mrb[4].mxu0 %v372_v45  ;;  %447 = vmatmul.mubr.bf16.vlgmr.msra.gmra.mrb[4].mxu1 %v372_v45 }
 0x156   :  { %513 = vmatpush1.bf16.msra.mxu0 %v1760_v3  ;;  %554 = vmatpush1.bf16.msra.mxu1 %v1762_v4 }
 0x157   :  { %514 = vmatprep.subr.bf16.mxu0 %v1765_v5  ;;  %555 = vmatprep.subr.bf16.mxu1 %v1769_v6 }
 0x158   :  { %544 = vmatprep.mubr.bf16.mxu0 %v1711_v0  ;;  %585 = vmatprep.mubr.bf16.mxu1 %v1711_v0 }
 0x15a   :  { %515 = vmatpush1.bf16.msra.mxu0 %v1771_v7  ;;  %556 = vmatpush1.bf16.msra.mxu1 %v1774_v8 }
 0x15b   :  { %516 = vmatprep.subr.bf16.mxu0 %v1777_v9  ;;  %557 = vmatprep.subr.bf16.mxu1 %v1779_v10 }
 0x15e   :  { %517 = vmatpush1.bf16.msra.mxu0 %v1781_v11  ;;  %558 = vmatpush1.bf16.msra.mxu1 %v1783_v12 }
 0x15f   :  { %518 = vmatprep.subr.bf16.mxu0 %v1787_v13  ;;  %559 = vmatprep.subr.bf16.mxu1 %v1791_v14 }
 0x162   :  { %519 = vmatpush1.bf16.msra.mxu0 %v1793_v15  ;;  %560 = vmatpush1.bf16.msra.mxu1 %v1797_v16 }
 0x163   :  { %520 = vmatprep.subr.bf16.mxu0 %v1799_v17  ;;  %561 = vmatprep.subr.bf16.mxu1 %v1803_v18 }
 0x166   :  { %521 = vmatpush1.bf16.msra.mxu0 %v1805_v19  ;;  %562 = vmatpush1.bf16.msra.mxu1 %v1807_v20 }
 0x167   :  { %522 = vmatprep.subr.bf16.mxu0 %v1811_v21  ;;  %563 = vmatprep.subr.bf16.mxu1 %v1815_v22 }
 0x16a   :  { %523 = vmatpush1.bf16.msra.mxu0 %v1819_v23  ;;  %564 = vmatpush1.bf16.msra.mxu1 %v1821_v24 }
 0x16b   :  { %524 = vmatprep.subr.bf16.mxu0 %v1825_v25  ;;  %565 = vmatprep.subr.bf16.mxu1 %v1827_v26 }
 0x16e   :  { %525 = vmatpush1.bf16.msra.mxu0 %v1831_v27  ;;  %566 = vmatpush1.bf16.msra.mxu1 %v1833_v28 }
 0x16f   :  { %526 = vmatprep.subr.bf16.mxu0 %v1837_v29  ;;  %567 = vmatprep.subr.bf16.mxu1 %v1839_v30 }
 0x172   :  { %527 = vmatpush1.bf16.msra.mxu0 %v1843_v31  ;;  %568 = vmatpush1.bf16.msra.mxu1 %v1845_v32 }
 0x173   :  { %651 = vmatprep.subr.bf16.mxu0 %v1755_v1  ;;  %692 = vmatprep.subr.bf16.mxu1 %v1757_v2 }
 0x228   :  { %v407_v46 = vpop.f32.mrb[4].mxu0  ;;  %v448_v47 = vpop.f32.mrb[4].mxu1 }
 0x229   :  { %v409_v48 = vpop.f32.mrb[5].mxu0  ;;  %v450_v49 = vpop.f32.mrb[5].mxu1 }
 0x22a   :  { %v459_v50 = vcombine.low %v407_v46, %v409_v48  ;;  %v460_v51 = vcombine.low %v448_v47, %v450_v49  ;;  %v411_v52 = vpop.f32.mrb[6].mxu0  ;;  %v452_v53 = vpop.f32.mrb[6].mxu1 }
 0x22b   :  { %v412_v54 = vpop.f32.mrb[7].mxu0  ;;  %v453_v55 = vpop.f32.mrb[7].mxu1 }
 0x22c   :  { %v467_v56 = vrot.slane %v459_v50, %v1889_v40  ;;  %v474_v57 = vrot.slane %v460_v51, %v1889_v40 }
 0x22e   :  { %v475_v59 = vcombine.low %v467_v56, %v474_v57 }
 0x230   :  { %v477_v60 = vadd.f32 %v475_v59, %v371_v58 }
 0x232   :  { %v1395_v61 = vmul.f32 -1.442695, %v477_v60  ;;  %v485_v62 = vrot.slane %v477_v60, 2  ;;  %v496_v33 = vrot.slane %v477_v60, 6  ;;  %v493_v36 = vrot.slane %v477_v60, 4 }
 0x234   :  { %1489 = vpow2.f32 %v1395_v61  ;;  %v1396_v63 = vmul.f32 -1.442695, %v485_v62  ;;  %v1397_v34 = vmul.f32 -1.442695, %v496_v33 }
 0x236   :  { %1491 = vpow2.f32 %v1396_v63 }
 0x237   :  { %1493 = vpow2.f32 %v1397_v34  ;;  %v510_v34 = vld [vmem:[#allocation2 + $0x10] sm:$0xff] }
 0x23e   :  { %v1490_v35 = vpop.eup %1489 }
 0x23f   :  { %v481_v37 = vadd.f32 1.0, %v1490_v35 }
 0x240   :  { %v1492_v38 = vpop.eup %1491 }
 0x241   :  { %1495 = vrcp.f32 %v481_v37  ;;  %v490_v39 = vadd.f32 1.0, %v1492_v38  ;;  %v1494_v42 = vpop.eup %1493 }
 0x242   :  { %1497 = vtanh.f32 %v493_v36  ;;  %v501_v46 = vadd.f32 1.0, %v1494_v42 }
 0x243   :  { %1499 = vrcp.f32 %v490_v39 }
 0x244   :  { %1501 = vrcp.f32 %v501_v46 }
 0x24b   :  { %v1496_v43 = vpop.eup %1495 }
 0x24c   :  { %v1498_v44 = vpop.eup %1497 }
 0x24d   :  { %v1500_v45 = vpop.eup %1499  ;;  %v505_v48 = vmul.f32 %v1498_v44, %v1496_v43 }
 0x24e   :  { %v504_v47 = vmul.f32 %v1500_v45, %v1893_v41  ;;  %v1502_v50 = vpop.eup %1501 }
 0x250   :  { %v1933_v49 = vadd.f32 %v505_v48, %v504_v47 }
 0x252   :  { %1503 = vtanh.f32 %v1933_v49 }
 0x25c   :  { %v1504_v51 = vpop.eup %1503 }
 0x25d   :  { %v508_v52 = vmul.f32 %v1504_v51, %v1502_v50 }
 0x25f   :  { %v511_v53 = vpack.c.bf16 %v508_v52, %v508_v52 }
 0x261   :  { %545 = vmatmul.mubr.bf16.vlgmr.msra.gmra.mrb[8].mxu0 %v511_v53  ;;  %586 = vmatmul.mubr.bf16.vlgmr.msra.gmra.mrb[8].mxu1 %v511_v53 }
 0x262   :  { %652 = vmatpush1.bf16.msra.mxu0 %v1760_v3  ;;  %693 = vmatpush1.bf16.msra.mxu1 %v1762_v4 }
 0x263   :  { %653 = vmatprep.subr.bf16.mxu0 %v1765_v5  ;;  %694 = vmatprep.subr.bf16.mxu1 %v1769_v6 }
 0x264   :  { %683 = vmatprep.mubr.bf16.mxu0 %v1711_v0  ;;  %724 = vmatprep.mubr.bf16.mxu1 %v1711_v0 }
 0x266   :  { %654 = vmatpush1.bf16.msra.mxu0 %v1771_v7  ;;  %695 = vmatpush1.bf16.msra.mxu1 %v1774_v8 }
 0x267   :  { %655 = vmatprep.subr.bf16.mxu0 %v1777_v9  ;;  %696 = vmatprep.subr.bf16.mxu1 %v1779_v10 }
 0x26a   :  { %656 = vmatpush1.bf16.msra.mxu0 %v1781_v11  ;;  %697 = vmatpush1.bf16.msra.mxu1 %v1783_v12 }
 0x26b   :  { %657 = vmatprep.subr.bf16.mxu0 %v1787_v13  ;;  %698 = vmatprep.subr.bf16.mxu1 %v1791_v14 }
 0x26e   :  { %658 = vmatpush1.bf16.msra.mxu0 %v1793_v15  ;;  %699 = vmatpush1.bf16.msra.mxu1 %v1797_v16 }
 0x26f   :  { %659 = vmatprep.subr.bf16.mxu0 %v1799_v17  ;;  %700 = vmatprep.subr.bf16.mxu1 %v1803_v18 }
 0x272   :  { %660 = vmatpush1.bf16.msra.mxu0 %v1805_v19  ;;  %701 = vmatpush1.bf16.msra.mxu1 %v1807_v20 }
 0x273   :  { %661 = vmatprep.subr.bf16.mxu0 %v1811_v21  ;;  %702 = vmatprep.subr.bf16.mxu1 %v1815_v22 }
 0x276   :  { %662 = vmatpush1.bf16.msra.mxu0 %v1819_v23  ;;  %703 = vmatpush1.bf16.msra.mxu1 %v1821_v24 }
 0x277   :  { %663 = vmatprep.subr.bf16.mxu0 %v1825_v25  ;;  %704 = vmatprep.subr.bf16.mxu1 %v1827_v26 }
 0x27a   :  { %664 = vmatpush1.bf16.msra.mxu0 %v1831_v27  ;;  %705 = vmatpush1.bf16.msra.mxu1 %v1833_v28 }
 0x27b   :  { %665 = vmatprep.subr.bf16.mxu0 %v1837_v29  ;;  %706 = vmatprep.subr.bf16.mxu1 %v1839_v30 }
 0x27e   :  { %666 = vmatpush1.bf16.msra.mxu0 %v1843_v31  ;;  %707 = vmatpush1.bf16.msra.mxu1 %v1845_v32 }
 0x27f   :  { %790 = vmatprep.subr.bf16.mxu0 %v1755_v1  ;;  %831 = vmatprep.subr.bf16.mxu1 %v1757_v2 }
 0x334   :  { %v546_v41 = vpop.f32.mrb[8].mxu0  ;;  %v587_v54 = vpop.f32.mrb[8].mxu1 }
 0x335   :  { %v548_v55 = vpop.f32.mrb[9].mxu0  ;;  %v589_v56 = vpop.f32.mrb[9].mxu1 }
 0x336   :  { %v598_v57 = vcombine.low %v546_v41, %v548_v55  ;;  %v599_v58 = vcombine.low %v587_v54, %v589_v56  ;;  %v550_v59 = vpop.f32.mrb[10].mxu0  ;;  %v591_v60 = vpop.f32.mrb[10].mxu1 }
 0x337   :  { %v551_v61 = vpop.f32.mrb[11].mxu0  ;;  %v592_v62 = vpop.f32.mrb[11].mxu1 }
 0x338   :  { %v606_v63 = vrot.slane %v598_v57, %v1889_v40  ;;  %v613_v33 = vrot.slane %v599_v58, %v1889_v40 }
 0x33a   :  { %v614_v35 = vcombine.low %v606_v63, %v613_v33 }
 0x33c   :  { %v616_v36 = vadd.f32 %v614_v35, %v510_v34 }
 0x33e   :  { %v1398_v37 = vmul.f32 -1.442695, %v616_v36  ;;  %v624_v38 = vrot.slane %v616_v36, 2  ;;  %v635_v42 = vrot.slane %v616_v36, 6  ;;  %v632_v45 = vrot.slane %v616_v36, 4 }
 0x340   :  { %1505 = vpow2.f32 %v1398_v37  ;;  %v1399_v39 = vmul.f32 -1.442695, %v624_v38  ;;  %v1400_v43 = vmul.f32 -1.442695, %v635_v42 }
 0x342   :  { %1507 = vpow2.f32 %v1399_v39 }
 0x343   :  { %1509 = vpow2.f32 %v1400_v43  ;;  %v649_v43 = vld [vmem:[#allocation2 + $0x18] sm:$0xff] }
 0x34a   :  { %v1506_v44 = vpop.eup %1505 }
 0x34b   :  { %v620_v46 = vadd.f32 1.0, %v1506_v44 }
 0x34c   :  { %v1508_v47 = vpop.eup %1507 }
 0x34d   :  { %1511 = vrcp.f32 %v620_v46  ;;  %v629_v48 = vadd.f32 1.0, %v1508_v47  ;;  %v1510_v50 = vpop.eup %1509 }
 0x34e   :  { %1513 = vtanh.f32 %v632_v45  ;;  %v640_v41 = vadd.f32 1.0, %v1510_v50 }
 0x34f   :  { %1515 = vrcp.f32 %v629_v48 }
 0x350   :  { %1517 = vrcp.f32 %v640_v41 }
 0x357   :  { %v1512_v51 = vpop.eup %1511 }
 0x358   :  { %v1514_v52 = vpop.eup %1513 }
 0x359   :  { %v1516_v53 = vpop.eup %1515  ;;  %v644_v55 = vmul.f32 %v1514_v52, %v1512_v51 }
 0x35a   :  { %v643_v54 = vmul.f32 %v1516_v53, %v1933_v49  ;;  %v1518_v57 = vpop.eup %1517 }
 0x35c   :  { %v1973_v56 = vadd.f32 %v644_v55, %v643_v54 }
 0x35e   :  { %1519 = vtanh.f32 %v1973_v56 }
 0x368   :  { %v1520_v58 = vpop.eup %1519 }
 0x369   :  { %v647_v59 = vmul.f32 %v1520_v58, %v1518_v57 }
 0x36b   :  { %v650_v60 = vpack.c.bf16 %v647_v59, %v647_v59 }
 0x36d   :  { %684 = vmatmul.mubr.bf16.vlgmr.msra.gmra.mrb[12].mxu0 %v650_v60  ;;  %725 = vmatmul.mubr.bf16.vlgmr.msra.gmra.mrb[12].mxu1 %v650_v60 }
 0x36e   :  { %791 = vmatpush1.bf16.msra.mxu0 %v1760_v3  ;;  %832 = vmatpush1.bf16.msra.mxu1 %v1762_v4 }
 0x36f   :  { %792 = vmatprep.subr.bf16.mxu0 %v1765_v5  ;;  %833 = vmatprep.subr.bf16.mxu1 %v1769_v6 }
 0x370   :  { %822 = vmatprep.mubr.bf16.mxu0 %v1711_v0  ;;  %863 = vmatprep.mubr.bf16.mxu1 %v1711_v0 }
 0x372   :  { %793 = vmatpush1.bf16.msra.mxu0 %v1771_v7  ;;  %834 = vmatpush1.bf16.msra.mxu1 %v1774_v8 }
 0x373   :  { %794 = vmatprep.subr.bf16.mxu0 %v1777_v9  ;;  %835 = vmatprep.subr.bf16.mxu1 %v1779_v10 }
 0x376   :  { %795 = vmatpush1.bf16.msra.mxu0 %v1781_v11  ;;  %836 = vmatpush1.bf16.msra.mxu1 %v1783_v12 }
 0x377   :  { %796 = vmatprep.subr.bf16.mxu0 %v1787_v13  ;;  %837 = vmatprep.subr.bf16.mxu1 %v1791_v14 }
 0x37a   :  { %797 = vmatpush1.bf16.msra.mxu0 %v1793_v15  ;;  %838 = vmatpush1.bf16.msra.mxu1 %v1797_v16 }
 0x37b   :  { %798 = vmatprep.subr.bf16.mxu0 %v1799_v17  ;;  %839 = vmatprep.subr.bf16.mxu1 %v1803_v18 }
 0x37e   :  { %799 = vmatpush1.bf16.msra.mxu0 %v1805_v19  ;;  %840 = vmatpush1.bf16.msra.mxu1 %v1807_v20 }
 0x37f   :  { %800 = vmatprep.subr.bf16.mxu0 %v1811_v21  ;;  %841 = vmatprep.subr.bf16.mxu1 %v1815_v22 }
 0x382   :  { %801 = vmatpush1.bf16.msra.mxu0 %v1819_v23  ;;  %842 = vmatpush1.bf16.msra.mxu1 %v1821_v24 }
 0x383   :  { %802 = vmatprep.subr.bf16.mxu0 %v1825_v25  ;;  %843 = vmatprep.subr.bf16.mxu1 %v1827_v26 }
 0x386   :  { %803 = vmatpush1.bf16.msra.mxu0 %v1831_v27  ;;  %844 = vmatpush1.bf16.msra.mxu1 %v1833_v28 }
 0x387   :  { %804 = vmatprep.subr.bf16.mxu0 %v1837_v29  ;;  %845 = vmatprep.subr.bf16.mxu1 %v1839_v30 }
 0x38a   :  { %805 = vmatpush1.bf16.msra.mxu0 %v1843_v31  ;;  %846 = vmatpush1.bf16.msra.mxu1 %v1845_v32 }
 0x38b   :  { %929 = vmatprep.subr.bf16.mxu0 %v1755_v1  ;;  %970 = vmatprep.subr.bf16.mxu1 %v1757_v2 }
 0x440   :  { %v685_v49 = vpop.f32.mrb[12].mxu0  ;;  %v726_v61 = vpop.f32.mrb[12].mxu1 }
 0x441   :  { %v687_v62 = vpop.f32.mrb[13].mxu0  ;;  %v728_v63 = vpop.f32.mrb[13].mxu1 }
 0x442   :  { %v737_v33 = vcombine.low %v685_v49, %v687_v62  ;;  %v738_v34 = vcombine.low %v726_v61, %v728_v63  ;;  %v689_v35 = vpop.f32.mrb[14].mxu0  ;;  %v730_v36 = vpop.f32.mrb[14].mxu1 }
 0x443   :  { %v690_v37 = vpop.f32.mrb[15].mxu0  ;;  %v731_v38 = vpop.f32.mrb[15].mxu1 }
 0x444   :  { %v745_v39 = vrot.slane %v737_v33, %v1889_v40  ;;  %v752_v42 = vrot.slane %v738_v34, %v1889_v40 }
 0x446   :  { %v753_v44 = vcombine.low %v745_v39, %v752_v42 }
 0x448   :  { %v755_v45 = vadd.f32 %v753_v44, %v649_v43 }
 0x44a   :  { %v1401_v46 = vmul.f32 -1.442695, %v755_v45  ;;  %v763_v47 = vrot.slane %v755_v45, 2  ;;  %v774_v50 = vrot.slane %v755_v45, 6  ;;  %v771_v53 = vrot.slane %v755_v45, 4 }
 0x44c   :  { %1521 = vpow2.f32 %v1401_v46  ;;  %v1402_v48 = vmul.f32 -1.442695, %v763_v47  ;;  %v1403_v51 = vmul.f32 -1.442695, %v774_v50 }
 0x44e   :  { %1523 = vpow2.f32 %v1402_v48 }
 0x44f   :  { %1525 = vpow2.f32 %v1403_v51  ;;  %v788_v51 = vld [vmem:[#allocation2 + $0x20] sm:$0xff] }
 0x456   :  { %v1522_v52 = vpop.eup %1521 }
 0x457   :  { %v759_v41 = vadd.f32 1.0, %v1522_v52 }
 0x458   :  { %v1524_v54 = vpop.eup %1523 }
 0x459   :  { %1527 = vrcp.f32 %v759_v41  ;;  %v768_v55 = vadd.f32 1.0, %v1524_v54  ;;  %v1526_v57 = vpop.eup %1525 }
 0x45a   :  { %1529 = vtanh.f32 %v771_v53  ;;  %v779_v49 = vadd.f32 1.0, %v1526_v57 }
 0x45b   :  { %1531 = vrcp.f32 %v768_v55 }
 0x45c   :  { %1533 = vrcp.f32 %v779_v49 }
 0x463   :  { %v1528_v58 = vpop.eup %1527 }
 0x464   :  { %v1530_v59 = vpop.eup %1529 }
 0x465   :  { %v1532_v60 = vpop.eup %1531  ;;  %v783_v62 = vmul.f32 %v1530_v59, %v1528_v58 }
 0x466   :  { %v782_v61 = vmul.f32 %v1532_v60, %v1973_v56  ;;  %v1534_v33 = vpop.eup %1533 }
 0x468   :  { %v2013_v63 = vadd.f32 %v783_v62, %v782_v61 }
 0x46a   :  { %1535 = vtanh.f32 %v2013_v63 }
 0x474   :  { %v1536_v34 = vpop.eup %1535 }
 0x475   :  { %v786_v35 = vmul.f32 %v1536_v34, %v1534_v33 }
 0x477   :  { %v789_v36 = vpack.c.bf16 %v786_v35, %v786_v35 }
 0x479   :  { %823 = vmatmul.mubr.bf16.vlgmr.msra.gmra.mrb[16].mxu0 %v789_v36  ;;  %864 = vmatmul.mubr.bf16.vlgmr.msra.gmra.mrb[16].mxu1 %v789_v36 }
 0x47a   :  { %930 = vmatpush1.bf16.msra.mxu0 %v1760_v3  ;;  %971 = vmatpush1.bf16.msra.mxu1 %v1762_v4 }
 0x47b   :  { %931 = vmatprep.subr.bf16.mxu0 %v1765_v5  ;;  %972 = vmatprep.subr.bf16.mxu1 %v1769_v6 }
 0x47c   :  { %961 = vmatprep.mubr.bf16.mxu0 %v1711_v0  ;;  %1002 = vmatprep.mubr.bf16.mxu1 %v1711_v0 }
 0x47e   :  { %932 = vmatpush1.bf16.msra.mxu0 %v1771_v7  ;;  %973 = vmatpush1.bf16.msra.mxu1 %v1774_v8 }
 0x47f   :  { %933 = vmatprep.subr.bf16.mxu0 %v1777_v9  ;;  %974 = vmatprep.subr.bf16.mxu1 %v1779_v10 }
 0x482   :  { %934 = vmatpush1.bf16.msra.mxu0 %v1781_v11  ;;  %975 = vmatpush1.bf16.msra.mxu1 %v1783_v12 }
 0x483   :  { %935 = vmatprep.subr.bf16.mxu0 %v1787_v13  ;;  %976 = vmatprep.subr.bf16.mxu1 %v1791_v14 }
 0x486   :  { %936 = vmatpush1.bf16.msra.mxu0 %v1793_v15  ;;  %977 = vmatpush1.bf16.msra.mxu1 %v1797_v16 }
 0x487   :  { %937 = vmatprep.subr.bf16.mxu0 %v1799_v17  ;;  %978 = vmatprep.subr.bf16.mxu1 %v1803_v18 }
 0x48a   :  { %938 = vmatpush1.bf16.msra.mxu0 %v1805_v19  ;;  %979 = vmatpush1.bf16.msra.mxu1 %v1807_v20 }
 0x48b   :  { %939 = vmatprep.subr.bf16.mxu0 %v1811_v21  ;;  %980 = vmatprep.subr.bf16.mxu1 %v1815_v22 }
 0x48e   :  { %940 = vmatpush1.bf16.msra.mxu0 %v1819_v23  ;;  %981 = vmatpush1.bf16.msra.mxu1 %v1821_v24 }
 0x48f   :  { %941 = vmatprep.subr.bf16.mxu0 %v1825_v25  ;;  %982 = vmatprep.subr.bf16.mxu1 %v1827_v26 }
 0x492   :  { %942 = vmatpush1.bf16.msra.mxu0 %v1831_v27  ;;  %983 = vmatpush1.bf16.msra.mxu1 %v1833_v28 }
 0x493   :  { %943 = vmatprep.subr.bf16.mxu0 %v1837_v29  ;;  %984 = vmatprep.subr.bf16.mxu1 %v1839_v30 }
 0x496   :  { %944 = vmatpush1.bf16.msra.mxu0 %v1843_v31  ;;  %985 = vmatpush1.bf16.msra.mxu1 %v1845_v32 }
 0x497   :  { %1068 = vmatprep.subr.bf16.mxu0 %v1755_v1  ;;  %1109 = vmatprep.subr.bf16.mxu1 %v1757_v2 }
 0x54c   :  { %v824_v56 = vpop.f32.mrb[16].mxu0  ;;  %v865_v37 = vpop.f32.mrb[16].mxu1 }
 0x54d   :  { %v826_v38 = vpop.f32.mrb[17].mxu0  ;;  %v867_v39 = vpop.f32.mrb[17].mxu1 }
 0x54e   :  { %v876_v42 = vcombine.low %v824_v56, %v826_v38  ;;  %v877_v43 = vcombine.low %v865_v37, %v867_v39  ;;  %v828_v44 = vpop.f32.mrb[18].mxu0  ;;  %v869_v45 = vpop.f32.mrb[18].mxu1 }
 0x54f   :  { %v829_v46 = vpop.f32.mrb[19].mxu0  ;;  %v870_v47 = vpop.f32.mrb[19].mxu1 }
 0x550   :  { %v884_v48 = vrot.slane %v876_v42, %v1889_v40  ;;  %v891_v50 = vrot.slane %v877_v43, %v1889_v40 }
 0x552   :  { %v892_v52 = vcombine.low %v884_v48, %v891_v50 }
 0x554   :  { %v894_v53 = vadd.f32 %v892_v52, %v788_v51 }
 0x556   :  { %v1404_v1 = vmul.f32 -1.442695, %v894_v53  ;;  %v902_v41 = vrot.slane %v894_v53, 2  ;;  %v913_v54 = vrot.slane %v894_v53, 6  ;;  %v910_v58 = vrot.slane %v894_v53, 4 }
 0x557   :  { %v1603_v53 = vld [vmem:[#allocation5] ss:$16 sps:$4 sm:$0xff]  }
 0x558   :  { %1537 = vpow2.f32 %v1404_v1  ;;  %v1405_v2 = vmul.f32 -1.442695, %v902_v41  ;;  %v1406_v55 = vmul.f32 -1.442695, %v913_v54  ;;  %v1604_v1 = vld [vmem:[#allocation5 + $0x8] ss:$16 sps:$4 sm:$0xff]  }
 0x559   :  { %v1605_v41 = vld [vmem:[#allocation5 + $0x24] ss:$16 sps:$4 sm:$0xff]   ;;  %v1607_v54 = vld [vmem:[#allocation5 + $0x20] ss:$16 sps:$4 sm:$0xff]  }
 0x55a   :  { %1539 = vpow2.f32 %v1405_v2  ;;  %v1606_v2 = vld [vmem:[#allocation5 + $0x2c] ss:$16 sps:$4 sm:$0xff]  }
 0x55b   :  { %1541 = vpow2.f32 %v1406_v55  ;;  %v1608_v55 = vld [vmem:[#allocation5 + $0x28] ss:$16 sps:$4 sm:$0xff]  }
 0x562   :  { %v1538_v57 = vpop.eup %1537 }
 0x563   :  { %v898_v59 = vadd.f32 1.0, %v1538_v57  ;;  %v1609_v57 = vld [vmem:[#allocation5 + $0x44] ss:$16 sps:$4 sm:$0xff]  }
 0x564   :  { %v1540_v60 = vpop.eup %1539 }
 0x565   :  { %1543 = vrcp.f32 %v898_v59  ;;  %v907_v49 = vadd.f32 1.0, %v1540_v60  ;;  %v1542_v61 = vpop.eup %1541  ;;  %v1611_v59 = vld [vmem:[#allocation5 + $0x40] ss:$16 sps:$4 sm:$0xff]   ;;  %v1612_v60 = vld [vmem:[#allocation5 + $0x48] ss:$16 sps:$4 sm:$0xff]  }
 0x566   :  { %1545 = vtanh.f32 %v910_v58  ;;  %v918_v35 = vadd.f32 1.0, %v1542_v61  ;;  %v1610_v58 = vld [vmem:[#allocation5 + $0x4c] ss:$16 sps:$4 sm:$0xff]  }
 0x567   :  { %1547 = vrcp.f32 %v907_v49  ;;  %v1613_v49 = vld [vmem:[#allocation5 + $0x64] ss:$16 sps:$4 sm:$0xff]   ;;  %v1614_v61 = vld [vmem:[#allocation5 + $0x6c] ss:$16 sps:$4 sm:$0xff]  }
 0x568   :  { %1549 = vrcp.f32 %v918_v35  ;;  %v1619_v35 = vld [vmem:[#allocation5 + $0x80] ss:$16 sps:$4 sm:$0xff]  }
 0x56f   :  { %v1544_v62 = vpop.eup %1543 }
 0x570   :  { %v1546_v33 = vpop.eup %1545 }
 0x571   :  { %v1548_v34 = vpop.eup %1547  ;;  %v922_v56 = vmul.f32 %v1546_v33, %v1544_v62  ;;  %v1615_v62 = vld [vmem:[#allocation5 + $0x60] ss:$16 sps:$4 sm:$0xff]   ;;  %v1616_v33 = vld [vmem:[#allocation5 + $0x68] ss:$16 sps:$4 sm:$0xff]  }
 0x572   :  { %v921_v36 = vmul.f32 %v1548_v34, %v2013_v63  ;;  %v1550_v38 = vpop.eup %1549  ;;  %v1618_v34 = vld [vmem:[#allocation5 + $0x8c] ss:$16 sps:$4 sm:$0xff]  }
 0x574   :  { %v2053_v37 = vadd.f32 %v922_v56, %v921_v36  ;;  %v1620_v36 = vld [vmem:[#allocation5 + $0x88] ss:$16 sps:$4 sm:$0xff]   ;;  %v1621_v56 = vld [vmem:[#allocation5 + $0xa4] ss:$16 sps:$4 sm:$0xff]  }
 0x576   :  { %1551 = vtanh.f32 %v2053_v37 }
 0x580   :  { %v1552_v39 = vpop.eup %1551 }
 0x581   :  { %v925_v42 = vmul.f32 %v1552_v39, %v1550_v38  ;;  %v1623_v38 = vld [vmem:[#allocation5 + $0xa0] ss:$16 sps:$4 sm:$0xff]   ;;  %v1624_v39 = vld [vmem:[#allocation5 + $0xa8] ss:$16 sps:$4 sm:$0xff]  }
 0x583   :  { %v928_v43 = vpack.c.bf16 %v925_v42, %v925_v42  ;;  %v1625_v42 = vld [vmem:[#allocation5 + $0xc4] ss:$16 sps:$4 sm:$0xff]  }
 0x585   :  { %962 = vmatmul.mubr.bf16.vlgmr.msra.gmra.mrb[20].mxu0 %v928_v43  ;;  %1003 = vmatmul.mubr.bf16.vlgmr.msra.gmra.mrb[20].mxu1 %v928_v43  ;;  %v1626_v43 = vld [vmem:[#allocation5 + $0xcc] ss:$16 sps:$4 sm:$0xff]  }
 0x586   :  { %1069 = vmatpush1.bf16.msra.mxu0 %v1760_v3  ;;  %1110 = vmatpush1.bf16.msra.mxu1 %v1762_v4  ;;  %v1601_v3 = vld [vmem:[#allocation5 + $0x4] ss:$16 sps:$4 sm:$0xff]   ;;  %v1602_v4 = vld [vmem:[#allocation5 + $0xc] ss:$16 sps:$4 sm:$0xff]  }
 0x587   :  { %1070 = vmatprep.subr.bf16.mxu0 %v1765_v5  ;;  %1111 = vmatprep.subr.bf16.mxu1 %v1769_v6 }
 0x588   :  { %1100 = vmatprep.mubr.bf16.mxu0 %v1711_v0  ;;  %1141 = vmatprep.mubr.bf16.mxu1 %v1711_v0 }
 0x58a   :  { %1071 = vmatpush1.bf16.msra.mxu0 %v1771_v7  ;;  %1112 = vmatpush1.bf16.msra.mxu1 %v1774_v8 }
 0x58b   :  { %1072 = vmatprep.subr.bf16.mxu0 %v1777_v9  ;;  %1113 = vmatprep.subr.bf16.mxu1 %v1779_v10 }
 0x58e   :  { %1073 = vmatpush1.bf16.msra.mxu0 %v1781_v11  ;;  %1114 = vmatpush1.bf16.msra.mxu1 %v1783_v12 }
 0x58f   :  { %1074 = vmatprep.subr.bf16.mxu0 %v1787_v13  ;;  %1115 = vmatprep.subr.bf16.mxu1 %v1791_v14 }
 0x592   :  { %1075 = vmatpush1.bf16.msra.mxu0 %v1793_v15  ;;  %1116 = vmatpush1.bf16.msra.mxu1 %v1797_v16 }
 0x593   :  { %1076 = vmatprep.subr.bf16.mxu0 %v1799_v17  ;;  %1117 = vmatprep.subr.bf16.mxu1 %v1803_v18  ;;  %v927_v17 = vld [vmem:[#allocation2 + $0x28] sm:$0xff] }
 0x596   :  { %1077 = vmatpush1.bf16.msra.mxu0 %v1805_v19  ;;  %1118 = vmatpush1.bf16.msra.mxu1 %v1807_v20 }
 0x597   :  { %1078 = vmatprep.subr.bf16.mxu0 %v1811_v21  ;;  %1119 = vmatprep.subr.bf16.mxu1 %v1815_v22 }
 0x59a   :  { %1079 = vmatpush1.bf16.msra.mxu0 %v1819_v23  ;;  %1120 = vmatpush1.bf16.msra.mxu1 %v1821_v24 }
 0x59b   :  { %1080 = vmatprep.subr.bf16.mxu0 %v1825_v25  ;;  %1121 = vmatprep.subr.bf16.mxu1 %v1827_v26 }
 0x59e   :  { %1081 = vmatpush1.bf16.msra.mxu0 %v1831_v27  ;;  %1122 = vmatpush1.bf16.msra.mxu1 %v1833_v28 }
 0x59f   :  { %1082 = vmatprep.subr.bf16.mxu0 %v1837_v29  ;;  %1123 = vmatprep.subr.bf16.mxu1 %v1839_v30 }
 0x5a2   :  { %1083 = vmatpush1.bf16.msra.mxu0 %v1843_v31  ;;  %1124 = vmatpush1.bf16.msra.mxu1 %v1845_v32 }
 0x5a3   :  { %1207 = vmatprep.subr.bf16.mxu0 %v1601_v3  ;;  %1248 = vmatprep.subr.bf16.mxu1 %v1602_v4  ;;  %v1627_v3 = vld [vmem:[#allocation5 + $0xc0] ss:$16 sps:$4 sm:$0xff]   ;;  %v1628_v4 = vld [vmem:[#allocation5 + $0xc8] ss:$16 sps:$4 sm:$0xff]  }
 0x658   :  { %v963_v5 = vpop.f32.mrb[20].mxu0  ;;  %v1004_v6 = vpop.f32.mrb[20].mxu1 }
 0x659   :  { %v965_v7 = vpop.f32.mrb[21].mxu0  ;;  %v1006_v8 = vpop.f32.mrb[21].mxu1 }
 0x65a   :  { %v1015_v9 = vcombine.low %v963_v5, %v965_v7  ;;  %v1016_v10 = vcombine.low %v1004_v6, %v1006_v8  ;;  %v967_v11 = vpop.f32.mrb[22].mxu0  ;;  %v1008_v12 = vpop.f32.mrb[22].mxu1  ;;  %v1629_v5 = vld [vmem:[#allocation5 + $0xe4] ss:$16 sps:$4 sm:$0xff]   ;;  %v1630_v6 = vld [vmem:[#allocation5 + $0xec] ss:$16 sps:$4 sm:$0xff]  }
 0x65b   :  { %v968_v13 = vpop.f32.mrb[23].mxu0  ;;  %v1009_v14 = vpop.f32.mrb[23].mxu1  ;;  %v1631_v7 = vld [vmem:[#allocation5 + $0xe0] ss:$16 sps:$4 sm:$0xff]   ;;  %v1632_v8 = vld [vmem:[#allocation5 + $0xe8] ss:$16 sps:$4 sm:$0xff]  }
 0x65c   :  { %v1023_v15 = vrot.slane %v1015_v9, %v1889_v40  ;;  %v1030_v16 = vrot.slane %v1016_v10, %v1889_v40 }
 0x65e   :  { %v1031_v18 = vcombine.low %v1023_v15, %v1030_v16 }
 0x660   :  { %v1033_v19 = vadd.f32 %v1031_v18, %v927_v17 }
 0x662   :  { %v1407_v20 = vmul.f32 -1.442695, %v1033_v19  ;;  %v1041_v21 = vrot.slane %v1033_v19, 2  ;;  %v1052_v23 = vrot.slane %v1033_v19, 6  ;;  %v1049_v26 = vrot.slane %v1033_v19, 4 }
 0x664   :  { %1553 = vpow2.f32 %v1407_v20  ;;  %v1408_v22 = vmul.f32 -1.442695, %v1041_v21  ;;  %v1409_v24 = vmul.f32 -1.442695, %v1052_v23  ;;  %v1066_v21 = vld [vmem:[#allocation2 + $0x30] sm:$0xff] }
 0x666   :  { %1555 = vpow2.f32 %v1408_v22 }
 0x667   :  { %1557 = vpow2.f32 %v1409_v24 }
 0x66e   :  { %v1554_v25 = vpop.eup %1553 }
 0x66f   :  { %v1037_v27 = vadd.f32 1.0, %v1554_v25 }
 0x670   :  { %v1556_v28 = vpop.eup %1555 }
 0x671   :  { %1559 = vrcp.f32 %v1037_v27  ;;  %v1046_v29 = vadd.f32 1.0, %v1556_v28  ;;  %v1558_v30 = vpop.eup %1557 }
 0x672   :  { %1561 = vtanh.f32 %v1049_v26  ;;  %v1057_v44 = vadd.f32 1.0, %v1558_v30 }
 0x673   :  { %1563 = vrcp.f32 %v1046_v29 }
 0x674   :  { %1565 = vrcp.f32 %v1057_v44 }
 0x67b   :  { %v1560_v31 = vpop.eup %1559 }
 0x67c   :  { %v1562_v32 = vpop.eup %1561 }
 0x67d   :  { %v1564_v63 = vpop.eup %1563  ;;  %v1061_v46 = vmul.f32 %v1562_v32, %v1560_v31 }
 0x67e   :  { %v1060_v45 = vmul.f32 %v1564_v63, %v2053_v37  ;;  %v1566_v48 = vpop.eup %1565  ;;  %v1622_v37 = vld [vmem:[#allocation5 + $0xac] ss:$16 sps:$4 sm:$0xff]  }
 0x680   :  { %v2091_v47 = vadd.f32 %v1061_v46, %v1060_v45 }
 0x682   :  { %1567 = vtanh.f32 %v2091_v47 }
 0x68c   :  { %v1568_v50 = vpop.eup %1567 }
 0x68d   :  { %v1064_v51 = vmul.f32 %v1568_v50, %v1566_v48 }
 0x68f   :  { %v1067_v52 = vpack.c.bf16 %v1064_v51, %v1064_v51 }
 0x691   :  { %1101 = vmatmul.mubr.bf16.vlgmr.msra.gmra.mrb[24].mxu0 %v1067_v52  ;;  %1142 = vmatmul.mubr.bf16.vlgmr.msra.gmra.mrb[24].mxu1 %v1067_v52 }
 0x692   :  { %1208 = vmatpush1.bf16.msra.mxu0 %v1603_v53  ;;  %1249 = vmatpush1.bf16.msra.mxu1 %v1604_v1 }
 0x693   :  { %1209 = vmatprep.subr.bf16.mxu0 %v1605_v41  ;;  %1250 = vmatprep.subr.bf16.mxu1 %v1606_v2 }
 0x694   :  { %1239 = vmatprep.mubr.bf16.mxu0 %v1711_v0  ;;  %1280 = vmatprep.mubr.bf16.mxu1 %v1711_v0  ;;  %v1617_v0 = vld [vmem:[#allocation5 + $0x84] ss:$16 sps:$4 sm:$0xff]  }
 0x696   :  { %1210 = vmatpush1.bf16.msra.mxu0 %v1607_v54  ;;  %1251 = vmatpush1.bf16.msra.mxu1 %v1608_v55 }
 0x697   :  { %1211 = vmatprep.subr.bf16.mxu0 %v1609_v57  ;;  %1252 = vmatprep.subr.bf16.mxu1 %v1610_v58 }
 0x69a   :  { %1212 = vmatpush1.bf16.msra.mxu0 %v1611_v59  ;;  %1253 = vmatpush1.bf16.msra.mxu1 %v1612_v60 }
 0x69b   :  { %1213 = vmatprep.subr.bf16.mxu0 %v1613_v49  ;;  %1254 = vmatprep.subr.bf16.mxu1 %v1614_v61 }
 0x69e   :  { %1214 = vmatpush1.bf16.msra.mxu0 %v1615_v62  ;;  %1255 = vmatpush1.bf16.msra.mxu1 %v1616_v33 }
 0x69f   :  { %1215 = vmatprep.subr.bf16.mxu0 %v1617_v0  ;;  %1256 = vmatprep.subr.bf16.mxu1 %v1618_v34 }
 0x6a2   :  { %1216 = vmatpush1.bf16.msra.mxu0 %v1619_v35  ;;  %1257 = vmatpush1.bf16.msra.mxu1 %v1620_v36  ;;  %v1205_v35 = vld [vmem:[#allocation2 + $0x38] sm:$0xff] }
 0x6a3   :  { %1217 = vmatprep.subr.bf16.mxu0 %v1621_v56  ;;  %1258 = vmatprep.subr.bf16.mxu1 %v1622_v37 }
 0x6a6   :  { %1218 = vmatpush1.bf16.msra.mxu0 %v1623_v38  ;;  %1259 = vmatpush1.bf16.msra.mxu1 %v1624_v39 }
 0x6a7   :  { %1219 = vmatprep.subr.bf16.mxu0 %v1625_v42  ;;  %1260 = vmatprep.subr.bf16.mxu1 %v1626_v43 }
 0x6aa   :  { %1220 = vmatpush1.bf16.msra.mxu0 %v1627_v3  ;;  %1261 = vmatpush1.bf16.msra.mxu1 %v1628_v4 }
 0x6ab   :  { %1221 = vmatprep.subr.bf16.mxu0 %v1629_v5  ;;  %1262 = vmatprep.subr.bf16.mxu1 %v1630_v6 }
 0x6ae   :  { %1222 = vmatpush1.bf16.msra.mxu0 %v1631_v7  ;;  %1263 = vmatpush1.bf16.msra.mxu1 %v1632_v8 }
 0x764   :  { %v1102_v9 = vpop.f32.mrb[24].mxu0  ;;  %v1143_v10 = vpop.f32.mrb[24].mxu1 }
 0x765   :  { %v1104_v11 = vpop.f32.mrb[25].mxu0  ;;  %v1145_v12 = vpop.f32.mrb[25].mxu1 }
 0x766   :  { %v1154_v13 = vcombine.low %v1102_v9, %v1104_v11  ;;  %v1155_v14 = vcombine.low %v1143_v10, %v1145_v12  ;;  %v1106_v15 = vpop.f32.mrb[26].mxu0  ;;  %v1147_v16 = vpop.f32.mrb[26].mxu1 }
 0x767   :  { %v1107_v17 = vpop.f32.mrb[27].mxu0  ;;  %v1148_v18 = vpop.f32.mrb[27].mxu1 }
 0x768   :  { %v1162_v19 = vrot.slane %v1154_v13, %v1889_v40  ;;  %v1169_v20 = vrot.slane %v1155_v14, %v1889_v40 }
 0x76a   :  { %v1170_v22 = vcombine.low %v1162_v19, %v1169_v20 }
 0x76c   :  { %v1172_v23 = vadd.f32 %v1170_v22, %v1066_v21 }
 0x76e   :  { %v1410_v24 = vmul.f32 -1.442695, %v1172_v23  ;;  %v1180_v25 = vrot.slane %v1172_v23, 2  ;;  %v1191_v27 = vrot.slane %v1172_v23, 6  ;;  %v1188_v30 = vrot.slane %v1172_v23, 4 }
 0x770   :  { %1569 = vpow2.f32 %v1410_v24  ;;  %v1411_v26 = vmul.f32 -1.442695, %v1180_v25  ;;  %v1412_v28 = vmul.f32 -1.442695, %v1191_v27 }
 0x772   :  { %1571 = vpow2.f32 %v1411_v26 }
 0x773   :  { %1573 = vpow2.f32 %v1412_v28 }
 0x77a   :  { %v1570_v29 = vpop.eup %1569 }
 0x77b   :  { %v1176_v31 = vadd.f32 1.0, %v1570_v29 }
 0x77c   :  { %v1572_v32 = vpop.eup %1571 }
 0x77d   :  { %1575 = vrcp.f32 %v1176_v31  ;;  %v1185_v63 = vadd.f32 1.0, %v1572_v32  ;;  %v1574_v44 = vpop.eup %1573 }
 0x77e   :  { %1577 = vtanh.f32 %v1188_v30  ;;  %v1196_v50 = vadd.f32 1.0, %v1574_v44 }
 0x77f   :  { %1579 = vrcp.f32 %v1185_v63 }
 0x780   :  { %1581 = vrcp.f32 %v1196_v50 }
 0x787   :  { %v1576_v45 = vpop.eup %1575 }
 0x788   :  { %v1578_v46 = vpop.eup %1577 }
 0x789   :  { %v1580_v48 = vpop.eup %1579  ;;  %v1200_v52 = vmul.f32 %v1578_v46, %v1576_v45 }
 0x78a   :  { %v1199_v51 = vmul.f32 %v1580_v48, %v2091_v47  ;;  %v1582_v1 = vpop.eup %1581 }
 0x78c   :  { %v1201_v53 = vadd.f32 %v1200_v52, %v1199_v51 }
 0x78e   :  { %1583 = vtanh.f32 %v1201_v53 }
 0x798   :  { %v1584_v41 = vpop.eup %1583 }
 0x799   :  { %v1203_v2 = vmul.f32 %v1584_v41, %v1582_v1 }
 0x79b   :  { %v1206_v54 = vpack.c.bf16 %v1203_v2, %v1203_v2 }
 0x79d   :  { %1240 = vmatmul.mubr.bf16.vlgmr.msra.gmra.mrb[28].mxu0 %v1206_v54  ;;  %1281 = vmatmul.mubr.bf16.vlgmr.msra.gmra.mrb[28].mxu1 %v1206_v54 }
 0x870   :  { %v1241_v55 = vpop.f32.mrb[28].mxu0  ;;  %v1282_v57 = vpop.f32.mrb[28].mxu1 }
 0x871   :  { %v1243_v58 = vpop.f32.mrb[29].mxu0  ;;  %v1284_v59 = vpop.f32.mrb[29].mxu1 }
 0x872   :  { %v1293_v60 = vcombine.low %v1241_v55, %v1243_v58  ;;  %v1294_v49 = vcombine.low %v1282_v57, %v1284_v59  ;;  %v1245_v61 = vpop.f32.mrb[30].mxu0  ;;  %v1286_v62 = vpop.f32.mrb[30].mxu1 }
 0x873   :  { %v1246_v33 = vpop.f32.mrb[31].mxu0  ;;  %v1287_v47 = vpop.f32.mrb[31].mxu1 }
 0x874   :  { %v1301_v0 = vrot.slane %v1293_v60, %v1889_v40  ;;  %v1308_v34 = vrot.slane %v1294_v49, %v1889_v40 }
 0x876   :  { %v1309_v36 = vcombine.low %v1301_v0, %v1308_v34 }
 0x878   :  { %v1311_v56 = vadd.f32 %v1309_v36, %v1205_v35 }
 0x87a   :  { %v1413_v37 = vmul.f32 -1.442695, %v1311_v56  ;;  %v1319_v38 = vrot.slane %v1311_v56, 2  ;;  %v1330_v42 = vrot.slane %v1311_v56, 6  ;;  %v1327_v4 = vrot.slane %v1311_v56, 4 }
 0x87c   :  { %1585 = vpow2.f32 %v1413_v37  ;;  %v1414_v39 = vmul.f32 -1.442695, %v1319_v38  ;;  %v1415_v43 = vmul.f32 -1.442695, %v1330_v42 }
 0x87e   :  { %1587 = vpow2.f32 %v1414_v39 }
 0x87f   :  { %1589 = vpow2.f32 %v1415_v43 }
 0x886   :  { %v1586_v3 = vpop.eup %1585 }
 0x887   :  { %v1315_v5 = vadd.f32 1.0, %v1586_v3 }
 0x888   :  { %v1588_v6 = vpop.eup %1587 }
 0x889   :  { %1591 = vrcp.f32 %v1315_v5  ;;  %v1324_v7 = vadd.f32 1.0, %v1588_v6  ;;  %v1590_v40 = vpop.eup %1589 }
 0x88a   :  { %1593 = vtanh.f32 %v1327_v4  ;;  %v1335_v11 = vadd.f32 1.0, %v1590_v40 }
 0x88b   :  { %1595 = vrcp.f32 %v1324_v7 }
 0x88c   :  { %1597 = vrcp.f32 %v1335_v11 }
 0x893   :  { %v1592_v8 = vpop.eup %1591 }
 0x894   :  { %v1594_v9 = vpop.eup %1593 }
 0x895   :  { %v1596_v10 = vpop.eup %1595  ;;  %v1339_v13 = vmul.f32 %v1594_v9, %v1592_v8 }
 0x896   :  { %v1338_v12 = vmul.f32 %v1596_v10, %v1201_v53  ;;  %v1598_v15 = vpop.eup %1597 }
 0x898   :  { %v1340_v14 = vadd.f32 %v1339_v13, %v1338_v12 }
 0x89a   :  { %1599 = vtanh.f32 %v1340_v14 }
 0x8a4   :  { %v1600_v16 = vpop.eup %1599 }
 0x8a5   :  { %v1342_v17 = vmul.f32 %v1600_v16, %v1598_v15 }
 0x8a7   :  { %1343 = vst [vmem:[#allocation7] sm:$0x3] %v1342_v17 }
 0x8a8   :  { %1688 = shalt.err (!%p1685_p6)
}
 0x8a9   :  { %s1689_s12 = scalar_lea.hbm %s2115_s2, 32 }
 0x8aa   :  { %p1690_p7 = scmp.ne.s32.totalorder %s2115_s2, %s1689_s12  ;;  %p1693_p8 = scmp.lt.u32.totalorder %s1689_s12, %s2115_s2 }
 0x8ac   :  { %p1695_p9 = pnand %p1693_p8, %p1690_p7 }
 0x8ae   :  { %1698 = shalt.err (!%p1695_p9)
}
 0x8af   :  { %1353 = dma.vmem_to_hbm [thread:$0]  %s1351_s8, 32, %s2115_s2, [#allocation4]  }
 0x8b0   :  { %1703 = dma.done.wait [#allocation4], 32  }
 0x8b1   :  { %1704 = vsyncadd [#allocation4], 4294967264 }
 0x8b2   :  { %1357 = vsyncpa [#allocation3], 1 }
 0x8b3   :  { %1358 = vsyncpa [#allocation6], 1 }
 0x8b4   :  { %1359 = vsyncpa [#allocation4], 1 }

</bundles_post_ra>
